<compile_context>
chip_gen: v6e
topology: v6e:2x2x1
jax: 0.10.0
libtpu: 0.0.40
codegen_flags: <defaults>
</compile_context>

<pallas_src>
import functools

import jax
import jax.numpy as jnp
from jax import lax
from jax.experimental import pallas as pl
from jax.experimental.pallas import tpu as pltpu


# ---------------------------------------------------------------------------
# Fused Pallas kernel
# ---------------------------------------------------------------------------
def _basic_block_kernel(x_ref, w1_ref, b1_ref, w2_ref, b2_ref, out_ref,
                        xpad_ref, mpad_ref, *, Nb, H, W, Cin, Cout):
    """Fully fused BasicBlock forward for Nb images (one grid step).

    x_ref   : (Nb, H, W*Cin)       input images, lane-packed (w, c) -> w*C + c
    w1_ref  : (3, W*Cin, W*Cout)   conv1 banded weights (BN1 scale + kw pad folded)
    b1_ref  : (1, W*Cout)          BN1 folded bias, tiled over W
    w2_ref  : (3, W*Cout, W*Cout)  conv2 banded weights (BN2 scale + kw pad folded)
    b2_ref  : (1, W*Cout)          BN2 folded bias, tiled over W
    out_ref : (Nb, H, W*Cout)
    xpad_ref: VMEM (Nb*(H+2), W*Cin)   row-padded staging of x (compute dtype)
    mpad_ref: VMEM (Nb*(H+2), W*Cout)  row-padded staging of relu(bn1(conv1))
    """
    cdt = xpad_ref.dtype
    S = H + 2                      # per-image row slot (1 halo row top + bottom)
    M = Nb * S - 2                 # stacked matmul M dimension

    # ---- stage inputs; zero ONLY the halo rows (2 per image slot).
    # Done every step (not once under program_id == 0): with
    # dimension_semantics=("parallel",) the grid may be split across v7x's two
    # TensorCores, each with its own scratch, and only one core sees step 0.
    # Cost: 4*Nb single-row stores per step (vs. full-scratch re-zero before).
    zx = jnp.zeros((1, W * Cin), cdt)
    zm = jnp.zeros((1, W * Cout), cdt)
    for n in range(Nb):            # static unroll
        r0 = n * S
        xpad_ref[r0:r0 + 1, :] = zx
        xpad_ref[r0 + H + 1:r0 + H + 2, :] = zx
        mpad_ref[r0:r0 + 1, :] = zm
        mpad_ref[r0 + H + 1:r0 + H + 2, :] = zm
        # full-lane-width interior store; single cast to the compute dtype here
        xpad_ref[r0 + 1:r0 + 1 + H, :] = x_ref[n].astype(cdt)

    # ---- conv1 + BN1 + ReLU : 3 banded matmuls (kh taps), all images at once
    y1 = jnp.zeros((M, W * Cout), jnp.float32)
    for kh in range(3):            # static unroll
        y1 = y1 + jnp.dot(xpad_ref[kh:kh + M, :], w1_ref[kh],
                          preferred_element_type=jnp.float32)
    y1 = jnp.maximum(y1 + b1_ref[...], 0.0)      # f32 epilogue (v5e-friendly)

    # ---- stage conv1 activation (+halo) in VMEM -- never touches HBM.
    # Rows straddling image boundaries are garbage and are discarded here.
    for n in range(Nb):
        r0 = n * S
        mpad_ref[r0 + 1:r0 + 1 + H, :] = y1[r0:r0 + H].astype(cdt)

    # ---- conv2 + BN2 + identity + ReLU
    y2 = jnp.zeros((M, W * Cout), jnp.float32)
    for kh in range(3):
        y2 = y2 + jnp.dot(mpad_ref[kh:kh + M, :], w2_ref[kh],
                          preferred_element_type=jnp.float32)
    for n in range(Nb):
        r0 = n * S
        res = y2[r0:r0 + H] + b2_ref[...] + x_ref[n]   # residual add, f32
        out_ref[n] = jnp.maximum(res, 0.0).astype(out_ref.dtype)


# ---------------------------------------------------------------------------
# Init-time parameter preparation (run ONCE, not per forward call)
# ---------------------------------------------------------------------------
def _fold_bn(gamma, beta, running_mean, running_var, eps=1e-5):
    scale = gamma / jnp.sqrt(running_var + eps)
    bias = beta - running_mean * scale
    return scale, bias


def _band_weights(w_hwio, scale, W):
    """Banded weights B[kh] of shape (W*Cin, W*Cout) such that
         conv3x3(x)[h, wo, co] == sum_kh  x_rowpad[h+kh, :] @ B[kh]
    in the (w, c)-lane-packed layout, with the BN scale and the WIDTH
    zero-padding folded in (out-of-range kw taps drop out of the one-hot
    band), so the kernel only pads rows, never lanes -> K = W*Cin exactly.
    """
    Kh, Kw, Cin, Cout = w_hwio.shape
    w = w_hwio * scale                                   # fold BN scale (per Cout)
    kw = jnp.arange(Kw)[:, None, None]
    wi = jnp.arange(W)[None, :, None]                    # UN-padded input column
    wo = jnp.arange(W)[None, None, :]                    # output column
    sel = (wi == wo + kw - 1).astype(w.dtype)            # (Kw, W, W) one-hot band
    band = jnp.einsum('kuv,hkio->huivo', sel, w)         # (Kh, W, Cin, W, Cout)
    return band.reshape(Kh, W * Cin, W * Cout)


def prepare_block_params(params, W, *, compute_dtype=jnp.bfloat16):
    """Fold BN into banded conv weights once at init.

    compute_dtype is the MXU operand dtype (bf16 default: native MXU rate on
    v5e/v6e/v7x, half the weight DMA).  Accumulation / epilogue stay float32.
    """
    Kh, Kw, Cin, Cout = params["w1"].shape
    s1, b1 = _fold_bn(params["bn1_gamma"], params["bn1_beta"],
                      params["bn1_mean"], params["bn1_var"])
    s2, b2 = _fold_bn(params["bn2_gamma"], params["bn2_beta"],
                      params["bn2_mean"], params["bn2_var"])
    return {
        "w1b": _band_weights(params["w1"], s1, W).astype(compute_dtype),
        "w2b": _band_weights(params["w2"], s2, W).astype(compute_dtype),
        "b1t": jnp.tile(b1, W).reshape(1, W * Cout).astype(jnp.float32),
        "b2t": jnp.tile(b2, W).reshape(1, W * Cout).astype(jnp.float32),
        "W": int(W), "Cin": int(Cin), "Cout": int(Cout),
    }


# ---------------------------------------------------------------------------
# Forward wrappers
# ---------------------------------------------------------------------------
def _default_images_per_step(N, H):
    # Fill the MXU M dimension (target ~128 stacked rows) while keeping >= 2
    # grid steps when possible so v7x can shard the "parallel" axis over 2 TCs.
    target = max(1, 128 // (H + 2))
    nb = max(1, min(target, N // 2 if N >= 2 else 1))
    while N % nb:
        nb -= 1
    return nb


def basic_block_forward_packed(x_packed, prepared, *, images_per_step=None):
    """Lane-packed entry point: x_packed is (N, H, W*Cin) float32 (NHWC packed)."""
    N, H, WC = x_packed.shape
    W, Cin, Cout = prepared["W"], prepared["Cin"], prepared["Cout"]
    assert WC == W * Cin
    # stride=1, dilation=1, downsample=None path only (identity residual)
    assert Cin == Cout, "identity residual requires inplanes == planes"

    Nb = images_per_step or _default_images_per_step(N, H)
    assert N % Nb == 0, (N, Nb)
    S = H + 2
    cdt = prepared["w1b"].dtype

    kernel = functools.partial(_basic_block_kernel, Nb=Nb, H=H, W=W,
                               Cin=Cin, Cout=Cout)

    return pl.pallas_call(
        kernel,
        out_shape=jax.ShapeDtypeStruct((N, H, W * Cout), jnp.float32),
        grid_spec=pltpu.PrefetchScalarGridSpec(
            num_scalar_prefetch=0,
            grid=(N // Nb,),
            in_specs=[
                pl.BlockSpec((Nb, H, W * Cin), lambda i: (i, 0, 0)),
                # constant-index weight/bias blocks: DMA'd once, stay resident
                pl.BlockSpec((3, W * Cin, W * Cout), lambda i: (0, 0, 0)),
                pl.BlockSpec((1, W * Cout), lambda i: (0, 0)),
                pl.BlockSpec((3, W * Cout, W * Cout), lambda i: (0, 0, 0)),
                pl.BlockSpec((1, W * Cout), lambda i: (0, 0)),
            ],
            out_specs=pl.BlockSpec((Nb, H, W * Cout), lambda i: (i, 0, 0)),
            scratch_shapes=[
                pltpu.VMEM((Nb * S, W * Cin), cdt),
                pltpu.VMEM((Nb * S, W * Cout), cdt),
            ],
        ),
        compiler_params=pltpu.CompilerParams(
            dimension_semantics=("parallel",)),
    )(x_packed, prepared["w1b"], prepared["b1t"],
      prepared["w2b"], prepared["b2t"])


def basic_block_forward(x_nchw, prepared, *, images_per_step=None):
    """NCHW (PyTorch-convention) entry point.

    An NHWC-resident model should call basic_block_forward_packed directly and
    skip these transposes.
    """
    N, Cin, H, W = x_nchw.shape
    x = jnp.transpose(x_nchw, (0, 2, 3, 1)).reshape(N, H, W * Cin)
    out = basic_block_forward_packed(x, prepared, images_per_step=images_per_step)
    out = out.reshape(N, H, W, prepared["Cout"])
    return jnp.transpose(out, (0, 3, 1, 2))


# ---------------------------------------------------------------------------
# Pure-JAX reference (lax.conv) for correctness checking
# ---------------------------------------------------------------------------
def basic_block_reference(x_nchw, params):
    def conv(x, w_hwio):
        return lax.conv_general_dilated(
            x, w_hwio, window_strides=(1, 1), padding=((1, 1), (1, 1)),
            dimension_numbers=("NCHW", "HWIO", "NCHW"))

    def bn(x, g, b, m, v, eps=1e-5):
        g = g.reshape(1, -1, 1, 1)
        b = b.reshape(1, -1, 1, 1)
        m = m.reshape(1, -1, 1, 1)
        v = v.reshape(1, -1, 1, 1)
        return (x - m) / jnp.sqrt(v + eps) * g + b

    identity = x_nchw
    out = conv(x_nchw, params["w1"])
    out = bn(out, params["bn1_gamma"], params["bn1_beta"],
             params["bn1_mean"], params["bn1_var"])
    out = jnp.maximum(out, 0.0)
    out = conv(out, params["w2"])
    out = bn(out, params["bn2_gamma"], params["bn2_beta"],
             params["bn2_mean"], params["bn2_var"])
    out = out + identity
    return jnp.maximum(out, 0.0)


# ---------------------------------------------------------------------------
# Deterministic parameter construction
# ---------------------------------------------------------------------------
def make_params(inplanes, planes, key):
    ks = jax.random.split(key, 10)
    w1 = 0.1 * jax.random.normal(ks[0], (3, 3, inplanes, planes), jnp.float32)
    w2 = 0.1 * jax.random.normal(ks[1], (3, 3, planes, planes), jnp.float32)
    return {
        "w1": w1,
        "w2": w2,
        "bn1_gamma": 1.0 + 0.1 * jax.random.normal(ks[2], (planes,), jnp.float32),
        "bn1_beta": 0.1 * jax.random.normal(ks[3], (planes,), jnp.float32),
        "bn1_mean": 0.1 * jax.random.normal(ks[4], (planes,), jnp.float32),
        "bn1_var": 1.0 + 0.1 * jnp.abs(jax.random.normal(ks[5], (planes,), jnp.float32)),
        "bn2_gamma": 1.0 + 0.1 * jax.random.normal(ks[6], (planes,), jnp.float32),
        "bn2_beta": 0.1 * jax.random.normal(ks[7], (planes,), jnp.float32),
        "bn2_mean": 0.1 * jax.random.normal(ks[8], (planes,), jnp.float32),
        "bn2_var": 1.0 + 0.1 * jnp.abs(jax.random.normal(ks[9], (planes,), jnp.float32)),
    }


if __name__ == "__main__":
    key = jax.random.PRNGKey(0)
    k_x, k_p = jax.random.split(key)

    # inplanes = planes = 8 (expansion = 1); W * C = 128 -> lane-dense blocks.
    # N = 8 -> default batching is 4 images per grid step (M = 4*(H+2)-2 = 70
    # stacked rows per banded matmul) across a 2-step "parallel" grid.
    N, C, H, W = 8, 8, 16, 16
    x = jax.random.normal(k_x, (N, C, H, W), jnp.float32)
    params = make_params(C, C, k_p)

    ref = jax.block_until_ready(basic_block_reference(x, params))

    # f32 MXU-operand path (tight check)
    prep32 = prepare_block_params(params, W, compute_dtype=jnp.float32)
    out = jax.block_until_ready(basic_block_forward(x, prep32))
    assert out.shape == (N, C, H, W), out.shape
    err = float(jnp.max(jnp.abs(out - ref)))
    assert err < 1e-4, f"f32 max abs err {err}"

    # default bf16 MXU-operand path (native rate on v5e/v6e/v7x); f32 accumulation
    prep16 = prepare_block_params(params, W)
    out_bf = jax.block_until_ready(basic_block_forward(x, prep16))
    err_bf = float(jnp.max(jnp.abs(out_bf - ref)))
    assert err_bf < 2e-1, f"bf16 max abs err {err_bf}"

    print("KERNEL_OK")
</pallas_src>

<mosaic_0001>
module attributes {stable_mosaic.version = 11 : i64} {
  func.func @_basic_block_kernel(%arg0: i32, %arg1: memref<4x16x128xf32, #tpu.memory_space<vmem>>, %arg2: memref<3x128x128xf32, #tpu.memory_space<vmem>>, %arg3: memref<1x128xf32, #tpu.memory_space<vmem>>, %arg4: memref<3x128x128xf32, #tpu.memory_space<vmem>>, %arg5: memref<1x128xf32, #tpu.memory_space<vmem>>, %arg6: memref<4x16x128xf32, #tpu.memory_space<vmem>>, %arg7: memref<72x128xf32, #tpu.memory_space<vmem>>, %arg8: memref<72x128xf32, #tpu.memory_space<vmem>>) attributes {dimension_semantics = [#tpu.dimension_semantics<parallel>], iteration_bounds = array<i64: 2>, scalar_prefetch = 0 : i64, scratch_operands = 2 : i64, tpu.core_type = #tpu.core_type<tc>, window_params = [{transform_indices = @transform_0, window_bounds = array<i64: 4, 16, 128>}, {pipeline_mode = #tpu.pipeline_mode<synchronous>, transform_indices = @transform_1, window_bounds = array<i64: 3, 128, 128>}, {pipeline_mode = #tpu.pipeline_mode<synchronous>, transform_indices = @transform_2, window_bounds = array<i64: 1, 128>}, {pipeline_mode = #tpu.pipeline_mode<synchronous>, transform_indices = @transform_3, window_bounds = array<i64: 3, 128, 128>}, {pipeline_mode = #tpu.pipeline_mode<synchronous>, transform_indices = @transform_4, window_bounds = array<i64: 1, 128>}, {transform_indices = @transform_5, window_bounds = array<i64: 4, 16, 128>}]} {
    %cst = arith.constant 0.000000e+00 : f32
    %0 = vector.broadcast %cst : f32 to vector<1x128xf32>
    %cst_0 = arith.constant 0.000000e+00 : f32
    %1 = vector.broadcast %cst_0 : f32 to vector<1x128xf32>
    %c0 = arith.constant 0 : index
    %c0_1 = arith.constant 0 : index
    %2 = vector.load %arg7[%c0, %c0_1] : memref<72x128xf32, #tpu.memory_space<vmem>>, vector<1x128xf32>
    tpu.vector_store %arg7[%c0, %c0_1], %0 {strides = array<i32>} : memref<72x128xf32, #tpu.memory_space<vmem>>, vector<1x128xf32>,
    %c17 = arith.constant 17 : index
    %c0_2 = arith.constant 0 : index
    %3 = vector.load %arg7[%c17, %c0_2] : memref<72x128xf32, #tpu.memory_space<vmem>>, vector<1x128xf32>
    tpu.vector_store %arg7[%c17, %c0_2], %0 {strides = array<i32>} : memref<72x128xf32, #tpu.memory_space<vmem>>, vector<1x128xf32>,
    %c0_3 = arith.constant 0 : index
    %c0_4 = arith.constant 0 : index
    %4 = vector.load %arg8[%c0_3, %c0_4] : memref<72x128xf32, #tpu.memory_space<vmem>>, vector<1x128xf32>
    tpu.vector_store %arg8[%c0_3, %c0_4], %1 {strides = array<i32>} : memref<72x128xf32, #tpu.memory_space<vmem>>, vector<1x128xf32>,
    %c17_5 = arith.constant 17 : index
    %c0_6 = arith.constant 0 : index
    %5 = vector.load %arg8[%c17_5, %c0_6] : memref<72x128xf32, #tpu.memory_space<vmem>>, vector<1x128xf32>
    tpu.vector_store %arg8[%c17_5, %c0_6], %1 {strides = array<i32>} : memref<72x128xf32, #tpu.memory_space<vmem>>, vector<1x128xf32>,
    %c0_7 = arith.constant 0 : index
    %c0_8 = arith.constant 0 : index
    %c0_9 = arith.constant 0 : index
    %6 = vector.load %arg1[%c0_7, %c0_8, %c0_9] : memref<4x16x128xf32, #tpu.memory_space<vmem>>, vector<1x16x128xf32>
    %7 = vector.shape_cast %6 : vector<1x16x128xf32> to vector<16x128xf32>
    %c1 = arith.constant 1 : index
    %c0_10 = arith.constant 0 : index
    %8 = vector.load %arg7[%c1, %c0_10] : memref<72x128xf32, #tpu.memory_space<vmem>>, vector<16x128xf32>
    tpu.vector_store %arg7[%c1, %c0_10], %7 {strides = array<i32>} : memref<72x128xf32, #tpu.memory_space<vmem>>, vector<16x128xf32>,
    %c18 = arith.constant 18 : index
    %c0_11 = arith.constant 0 : index
    %9 = vector.load %arg7[%c18, %c0_11] : memref<72x128xf32, #tpu.memory_space<vmem>>, vector<1x128xf32>
    tpu.vector_store %arg7[%c18, %c0_11], %0 {strides = array<i32>} : memref<72x128xf32, #tpu.memory_space<vmem>>, vector<1x128xf32>,
    %c35 = arith.constant 35 : index
    %c0_12 = arith.constant 0 : index
    %10 = vector.load %arg7[%c35, %c0_12] : memref<72x128xf32, #tpu.memory_space<vmem>>, vector<1x128xf32>
    tpu.vector_store %arg7[%c35, %c0_12], %0 {strides = array<i32>} : memref<72x128xf32, #tpu.memory_space<vmem>>, vector<1x128xf32>,
    %c18_13 = arith.constant 18 : index
    %c0_14 = arith.constant 0 : index
    %11 = vector.load %arg8[%c18_13, %c0_14] : memref<72x128xf32, #tpu.memory_space<vmem>>, vector<1x128xf32>
    tpu.vector_store %arg8[%c18_13, %c0_14], %1 {strides = array<i32>} : memref<72x128xf32, #tpu.memory_space<vmem>>, vector<1x128xf32>,
    %c35_15 = arith.constant 35 : index
    %c0_16 = arith.constant 0 : index
    %12 = vector.load %arg8[%c35_15, %c0_16] : memref<72x128xf32, #tpu.memory_space<vmem>>, vector<1x128xf32>
    tpu.vector_store %arg8[%c35_15, %c0_16], %1 {strides = array<i32>} : memref<72x128xf32, #tpu.memory_space<vmem>>, vector<1x128xf32>,
    %c1_17 = arith.constant 1 : index
    %c0_18 = arith.constant 0 : index
    %c0_19 = arith.constant 0 : index
    %13 = vector.load %arg1[%c1_17, %c0_18, %c0_19] : memref<4x16x128xf32, #tpu.memory_space<vmem>>, vector<1x16x128xf32>
    %14 = vector.shape_cast %13 : vector<1x16x128xf32> to vector<16x128xf32>
    %c19 = arith.constant 19 : index
    %c0_20 = arith.constant 0 : index
    %15 = vector.load %arg7[%c19, %c0_20] : memref<72x128xf32, #tpu.memory_space<vmem>>, vector<16x128xf32>
    tpu.vector_store %arg7[%c19, %c0_20], %14 {strides = array<i32>} : memref<72x128xf32, #tpu.memory_space<vmem>>, vector<16x128xf32>,
    %c36 = arith.constant 36 : index
    %c0_21 = arith.constant 0 : index
    %16 = vector.load %arg7[%c36, %c0_21] : memref<72x128xf32, #tpu.memory_space<vmem>>, vector<1x128xf32>
    tpu.vector_store %arg7[%c36, %c0_21], %0 {strides = array<i32>} : memref<72x128xf32, #tpu.memory_space<vmem>>, vector<1x128xf32>,
    %c53 = arith.constant 53 : index
    %c0_22 = arith.constant 0 : index
    %17 = vector.load %arg7[%c53, %c0_22] : memref<72x128xf32, #tpu.memory_space<vmem>>, vector<1x128xf32>
    tpu.vector_store %arg7[%c53, %c0_22], %0 {strides = array<i32>} : memref<72x128xf32, #tpu.memory_space<vmem>>, vector<1x128xf32>,
    %c36_23 = arith.constant 36 : index
    %c0_24 = arith.constant 0 : index
    %18 = vector.load %arg8[%c36_23, %c0_24] : memref<72x128xf32, #tpu.memory_space<vmem>>, vector<1x128xf32>
    tpu.vector_store %arg8[%c36_23, %c0_24], %1 {strides = array<i32>} : memref<72x128xf32, #tpu.memory_space<vmem>>, vector<1x128xf32>,
    %c53_25 = arith.constant 53 : index
    %c0_26 = arith.constant 0 : index
    %19 = vector.load %arg8[%c53_25, %c0_26] : memref<72x128xf32, #tpu.memory_space<vmem>>, vector<1x128xf32>
    tpu.vector_store %arg8[%c53_25, %c0_26], %1 {strides = array<i32>} : memref<72x128xf32, #tpu.memory_space<vmem>>, vector<1x128xf32>,
    %c2 = arith.constant 2 : index
    %c0_27 = arith.constant 0 : index
    %c0_28 = arith.constant 0 : index
    %20 = vector.load %arg1[%c2, %c0_27, %c0_28] : memref<4x16x128xf32, #tpu.memory_space<vmem>>, vector<1x16x128xf32>
    %21 = vector.shape_cast %20 : vector<1x16x128xf32> to vector<16x128xf32>
    %c37 = arith.constant 37 : index
    %c0_29 = arith.constant 0 : index
    %22 = vector.load %arg7[%c37, %c0_29] : memref<72x128xf32, #tpu.memory_space<vmem>>, vector<16x128xf32>
    tpu.vector_store %arg7[%c37, %c0_29], %21 {strides = array<i32>} : memref<72x128xf32, #tpu.memory_space<vmem>>, vector<16x128xf32>,
    %c54 = arith.constant 54 : index
    %c0_30 = arith.constant 0 : index
    %23 = vector.load %arg7[%c54, %c0_30] : memref<72x128xf32, #tpu.memory_space<vmem>>, vector<1x128xf32>
    tpu.vector_store %arg7[%c54, %c0_30], %0 {strides = array<i32>} : memref<72x128xf32, #tpu.memory_space<vmem>>, vector<1x128xf32>,
    %c71 = arith.constant 71 : index
    %c0_31 = arith.constant 0 : index
    %24 = vector.load %arg7[%c71, %c0_31] : memref<72x128xf32, #tpu.memory_space<vmem>>, vector<1x128xf32>
    tpu.vector_store %arg7[%c71, %c0_31], %0 {strides = array<i32>} : memref<72x128xf32, #tpu.memory_space<vmem>>, vector<1x128xf32>,
    %c54_32 = arith.constant 54 : index
    %c0_33 = arith.constant 0 : index
    %25 = vector.load %arg8[%c54_32, %c0_33] : memref<72x128xf32, #tpu.memory_space<vmem>>, vector<1x128xf32>
    tpu.vector_store %arg8[%c54_32, %c0_33], %1 {strides = array<i32>} : memref<72x128xf32, #tpu.memory_space<vmem>>, vector<1x128xf32>,
    %c71_34 = arith.constant 71 : index
    %c0_35 = arith.constant 0 : index
    %26 = vector.load %arg8[%c71_34, %c0_35] : memref<72x128xf32, #tpu.memory_space<vmem>>, vector<1x128xf32>
    tpu.vector_store %arg8[%c71_34, %c0_35], %1 {strides = array<i32>} : memref<72x128xf32, #tpu.memory_space<vmem>>, vector<1x128xf32>,
    %c3 = arith.constant 3 : index
    %c0_36 = arith.constant 0 : index
    %c0_37 = arith.constant 0 : index
    %27 = vector.load %arg1[%c3, %c0_36, %c0_37] : memref<4x16x128xf32, #tpu.memory_space<vmem>>, vector<1x16x128xf32>
    %28 = vector.shape_cast %27 : vector<1x16x128xf32> to vector<16x128xf32>
    %c55 = arith.constant 55 : index
    %c0_38 = arith.constant 0 : index
    %29 = vector.load %arg7[%c55, %c0_38] : memref<72x128xf32, #tpu.memory_space<vmem>>, vector<16x128xf32>
    tpu.vector_store %arg7[%c55, %c0_38], %28 {strides = array<i32>} : memref<72x128xf32, #tpu.memory_space<vmem>>, vector<16x128xf32>,
    %cst_39 = arith.constant 0.000000e+00 : f32
    %30 = vector.broadcast %cst_39 : f32 to vector<70x128xf32>
    %c0_40 = arith.constant 0 : index
    %c0_41 = arith.constant 0 : index
    %31 = vector.load %arg7[%c0_40, %c0_41] : memref<72x128xf32, #tpu.memory_space<vmem>>, vector<70x128xf32>
    %c0_42 = arith.constant 0 : index
    %c0_43 = arith.constant 0 : index
    %c0_44 = arith.constant 0 : index
    %32 = vector.load %arg2[%c0_42, %c0_43, %c0_44] : memref<3x128x128xf32, #tpu.memory_space<vmem>>, vector<1x128x128xf32>
    %33 = vector.shape_cast %32 : vector<1x128x128xf32> to vector<128x128xf32>
    %cst_45 = arith.constant dense<0.000000e+00> : vector<70x128xf32>
    %34 = tpu.matmul %31, %33, %cst_45 {dimension_numbers = #tpu.dot_dimension_numbers<[1], [0], [0], [1], [0, 0, 1, 1], [], []>} : vector<70x128xf32>, vector<128x128xf32>, vector<70x128xf32> -> vector<70x128xf32>
    %35 = arith.addf %30, %34 : vector<70x128xf32>
    %c1_46 = arith.constant 1 : index
    %c0_47 = arith.constant 0 : index
    %36 = vector.load %arg7[%c1_46, %c0_47] : memref<72x128xf32, #tpu.memory_space<vmem>>, vector<70x128xf32>
    %c1_48 = arith.constant 1 : index
    %c0_49 = arith.constant 0 : index
    %c0_50 = arith.constant 0 : index
    %37 = vector.load %arg2[%c1_48, %c0_49, %c0_50] : memref<3x128x128xf32, #tpu.memory_space<vmem>>, vector<1x128x128xf32>
    %38 = vector.shape_cast %37 : vector<1x128x128xf32> to vector<128x128xf32>
    %cst_51 = arith.constant dense<0.000000e+00> : vector<70x128xf32>
    %39 = tpu.matmul %36, %38, %cst_51 {dimension_numbers = #tpu.dot_dimension_numbers<[1], [0], [0], [1], [0, 0, 1, 1], [], []>} : vector<70x128xf32>, vector<128x128xf32>, vector<70x128xf32> -> vector<70x128xf32>
    %40 = arith.addf %35, %39 : vector<70x128xf32>
    %c2_52 = arith.constant 2 : index
    %c0_53 = arith.constant 0 : index
    %41 = vector.load %arg7[%c2_52, %c0_53] : memref<72x128xf32, #tpu.memory_space<vmem>>, vector<70x128xf32>
    %c2_54 = arith.constant 2 : index
    %c0_55 = arith.constant 0 : index
    %c0_56 = arith.constant 0 : index
    %42 = vector.load %arg2[%c2_54, %c0_55, %c0_56] : memref<3x128x128xf32, #tpu.memory_space<vmem>>, vector<1x128x128xf32>
    %43 = vector.shape_cast %42 : vector<1x128x128xf32> to vector<128x128xf32>
    %cst_57 = arith.constant dense<0.000000e+00> : vector<70x128xf32>
    %44 = tpu.matmul %41, %43, %cst_57 {dimension_numbers = #tpu.dot_dimension_numbers<[1], [0], [0], [1], [0, 0, 1, 1], [], []>} : vector<70x128xf32>, vector<128x128xf32>, vector<70x128xf32> -> vector<70x128xf32>
    %45 = arith.addf %40, %44 : vector<70x128xf32>
    %c0_58 = arith.constant 0 : index
    %c0_59 = arith.constant 0 : index
    %46 = vector.load %arg3[%c0_58, %c0_59] : memref<1x128xf32, #tpu.memory_space<vmem>>, vector<1x128xf32>
    %47 = vector.broadcast %46 : vector<1x128xf32> to vector<70x128xf32>
    %48 = arith.addf %45, %47 : vector<70x128xf32>
    %cst_60 = arith.constant 0.000000e+00 : f32
    %49 = vector.broadcast %cst_60 : f32 to vector<70x128xf32>
    %50 = arith.maximumf %48, %49 : vector<70x128xf32>
    %51 = vector.extract_strided_slice %50 {offsets = [0, 0], sizes = [16, 128], strides = [1, 1]} : vector<70x128xf32> to vector<16x128xf32>
    %c1_61 = arith.constant 1 : index
    %c0_62 = arith.constant 0 : index
    %52 = vector.load %arg8[%c1_61, %c0_62] : memref<72x128xf32, #tpu.memory_space<vmem>>, vector<16x128xf32>
    tpu.vector_store %arg8[%c1_61, %c0_62], %51 {strides = array<i32>} : memref<72x128xf32, #tpu.memory_space<vmem>>, vector<16x128xf32>,
    %53 = vector.extract_strided_slice %50 {offsets = [18, 0], sizes = [16, 128], strides = [1, 1]} : vector<70x128xf32> to vector<16x128xf32>
    %c19_63 = arith.constant 19 : index
    %c0_64 = arith.constant 0 : index
    %54 = vector.load %arg8[%c19_63, %c0_64] : memref<72x128xf32, #tpu.memory_space<vmem>>, vector<16x128xf32>
    tpu.vector_store %arg8[%c19_63, %c0_64], %53 {strides = array<i32>} : memref<72x128xf32, #tpu.memory_space<vmem>>, vector<16x128xf32>,
    %55 = vector.extract_strided_slice %50 {offsets = [36, 0], sizes = [16, 128], strides = [1, 1]} : vector<70x128xf32> to vector<16x128xf32>
    %c37_65 = arith.constant 37 : index
    %c0_66 = arith.constant 0 : index
    %56 = vector.load %arg8[%c37_65, %c0_66] : memref<72x128xf32, #tpu.memory_space<vmem>>, vector<16x128xf32>
    tpu.vector_store %arg8[%c37_65, %c0_66], %55 {strides = array<i32>} : memref<72x128xf32, #tpu.memory_space<vmem>>, vector<16x128xf32>,
    %57 = vector.extract_strided_slice %50 {offsets = [54, 0], sizes = [16, 128], strides = [1, 1]} : vector<70x128xf32> to vector<16x128xf32>
    %c55_67 = arith.constant 55 : index
    %c0_68 = arith.constant 0 : index
    %58 = vector.load %arg8[%c55_67, %c0_68] : memref<72x128xf32, #tpu.memory_space<vmem>>, vector<16x128xf32>
    tpu.vector_store %arg8[%c55_67, %c0_68], %57 {strides = array<i32>} : memref<72x128xf32, #tpu.memory_space<vmem>>, vector<16x128xf32>,
    %cst_69 = arith.constant 0.000000e+00 : f32
    %59 = vector.broadcast %cst_69 : f32 to vector<70x128xf32>
    %c0_70 = arith.constant 0 : index
    %c0_71 = arith.constant 0 : index
    %60 = vector.load %arg8[%c0_70, %c0_71] : memref<72x128xf32, #tpu.memory_space<vmem>>, vector<70x128xf32>
    %c0_72 = arith.constant 0 : index
    %c0_73 = arith.constant 0 : index
    %c0_74 = arith.constant 0 : index
    %61 = vector.load %arg4[%c0_72, %c0_73, %c0_74] : memref<3x128x128xf32, #tpu.memory_space<vmem>>, vector<1x128x128xf32>
    %62 = vector.shape_cast %61 : vector<1x128x128xf32> to vector<128x128xf32>
    %cst_75 = arith.constant dense<0.000000e+00> : vector<70x128xf32>
    %63 = tpu.matmul %60, %62, %cst_75 {dimension_numbers = #tpu.dot_dimension_numbers<[1], [0], [0], [1], [0, 0, 1, 1], [], []>} : vector<70x128xf32>, vector<128x128xf32>, vector<70x128xf32> -> vector<70x128xf32>
    %64 = arith.addf %59, %63 : vector<70x128xf32>
    %c1_76 = arith.constant 1 : index
    %c0_77 = arith.constant 0 : index
    %65 = vector.load %arg8[%c1_76, %c0_77] : memref<72x128xf32, #tpu.memory_space<vmem>>, vector<70x128xf32>
    %c1_78 = arith.constant 1 : index
    %c0_79 = arith.constant 0 : index
    %c0_80 = arith.constant 0 : index
    %66 = vector.load %arg4[%c1_78, %c0_79, %c0_80] : memref<3x128x128xf32, #tpu.memory_space<vmem>>, vector<1x128x128xf32>
    %67 = vector.shape_cast %66 : vector<1x128x128xf32> to vector<128x128xf32>
    %cst_81 = arith.constant dense<0.000000e+00> : vector<70x128xf32>
    %68 = tpu.matmul %65, %67, %cst_81 {dimension_numbers = #tpu.dot_dimension_numbers<[1], [0], [0], [1], [0, 0, 1, 1], [], []>} : vector<70x128xf32>, vector<128x128xf32>, vector<70x128xf32> -> vector<70x128xf32>
    %69 = arith.addf %64, %68 : vector<70x128xf32>
    %c2_82 = arith.constant 2 : index
    %c0_83 = arith.constant 0 : index
    %70 = vector.load %arg8[%c2_82, %c0_83] : memref<72x128xf32, #tpu.memory_space<vmem>>, vector<70x128xf32>
    %c2_84 = arith.constant 2 : index
    %c0_85 = arith.constant 0 : index
    %c0_86 = arith.constant 0 : index
    %71 = vector.load %arg4[%c2_84, %c0_85, %c0_86] : memref<3x128x128xf32, #tpu.memory_space<vmem>>, vector<1x128x128xf32>
    %72 = vector.shape_cast %71 : vector<1x128x128xf32> to vector<128x128xf32>
    %cst_87 = arith.constant dense<0.000000e+00> : vector<70x128xf32>
    %73 = tpu.matmul %70, %72, %cst_87 {dimension_numbers = #tpu.dot_dimension_numbers<[1], [0], [0], [1], [0, 0, 1, 1], [], []>} : vector<70x128xf32>, vector<128x128xf32>, vector<70x128xf32> -> vector<70x128xf32>
    %74 = arith.addf %69, %73 : vector<70x128xf32>
    %75 = vector.extract_strided_slice %74 {offsets = [0, 0], sizes = [16, 128], strides = [1, 1]} : vector<70x128xf32> to vector<16x128xf32>
    %c0_88 = arith.constant 0 : index
    %c0_89 = arith.constant 0 : index
    %76 = vector.load %arg5[%c0_88, %c0_89] : memref<1x128xf32, #tpu.memory_space<vmem>>, vector<1x128xf32>
    %77 = vector.broadcast %76 : vector<1x128xf32> to vector<16x128xf32>
    %78 = arith.addf %75, %77 : vector<16x128xf32>
    %c0_90 = arith.constant 0 : index
    %c0_91 = arith.constant 0 : index
    %c0_92 = arith.constant 0 : index
    %79 = vector.load %arg1[%c0_90, %c0_91, %c0_92] : memref<4x16x128xf32, #tpu.memory_space<vmem>>, vector<1x16x128xf32>
    %80 = vector.shape_cast %79 : vector<1x16x128xf32> to vector<16x128xf32>
    %81 = arith.addf %78, %80 : vector<16x128xf32>
    %cst_93 = arith.constant 0.000000e+00 : f32
    %82 = vector.broadcast %cst_93 : f32 to vector<16x128xf32>
    %83 = arith.maximumf %81, %82 : vector<16x128xf32>
    %c0_94 = arith.constant 0 : index
    %c0_95 = arith.constant 0 : index
    %c0_96 = arith.constant 0 : index
    %84 = vector.load %arg6[%c0_94, %c0_95, %c0_96] : memref<4x16x128xf32, #tpu.memory_space<vmem>>, vector<1x16x128xf32>
    %85 = vector.shape_cast %84 : vector<1x16x128xf32> to vector<16x128xf32>
    %86 = vector.shape_cast %83 : vector<16x128xf32> to vector<1x16x128xf32>
    tpu.vector_store %arg6[%c0_94, %c0_95, %c0_96], %86 {strides = array<i32>} : memref<4x16x128xf32, #tpu.memory_space<vmem>>, vector<1x16x128xf32>,
    %87 = vector.extract_strided_slice %74 {offsets = [18, 0], sizes = [16, 128], strides = [1, 1]} : vector<70x128xf32> to vector<16x128xf32>
    %c0_97 = arith.constant 0 : index
    %c0_98 = arith.constant 0 : index
    %88 = vector.load %arg5[%c0_97, %c0_98] : memref<1x128xf32, #tpu.memory_space<vmem>>, vector<1x128xf32>
    %89 = vector.broadcast %88 : vector<1x128xf32> to vector<16x128xf32>
    %90 = arith.addf %87, %89 : vector<16x128xf32>
    %c1_99 = arith.constant 1 : index
    %c0_100 = arith.constant 0 : index
    %c0_101 = arith.constant 0 : index
    %91 = vector.load %arg1[%c1_99, %c0_100, %c0_101] : memref<4x16x128xf32, #tpu.memory_space<vmem>>, vector<1x16x128xf32>
    %92 = vector.shape_cast %91 : vector<1x16x128xf32> to vector<16x128xf32>
    %93 = arith.addf %90, %92 : vector<16x128xf32>
    %cst_102 = arith.constant 0.000000e+00 : f32
    %94 = vector.broadcast %cst_102 : f32 to vector<16x128xf32>
    %95 = arith.maximumf %93, %94 : vector<16x128xf32>
    %c1_103 = arith.constant 1 : index
    %c0_104 = arith.constant 0 : index
    %c0_105 = arith.constant 0 : index
    %96 = vector.load %arg6[%c1_103, %c0_104, %c0_105] : memref<4x16x128xf32, #tpu.memory_space<vmem>>, vector<1x16x128xf32>
    %97 = vector.shape_cast %96 : vector<1x16x128xf32> to vector<16x128xf32>
    %98 = vector.shape_cast %95 : vector<16x128xf32> to vector<1x16x128xf32>
    tpu.vector_store %arg6[%c1_103, %c0_104, %c0_105], %98 {strides = array<i32>} : memref<4x16x128xf32, #tpu.memory_space<vmem>>, vector<1x16x128xf32>,
    %99 = vector.extract_strided_slice %74 {offsets = [36, 0], sizes = [16, 128], strides = [1, 1]} : vector<70x128xf32> to vector<16x128xf32>
    %c0_106 = arith.constant 0 : index
    %c0_107 = arith.constant 0 : index
    %100 = vector.load %arg5[%c0_106, %c0_107] : memref<1x128xf32, #tpu.memory_space<vmem>>, vector<1x128xf32>
    %101 = vector.broadcast %100 : vector<1x128xf32> to vector<16x128xf32>
    %102 = arith.addf %99, %101 : vector<16x128xf32>
    %c2_108 = arith.constant 2 : index
    %c0_109 = arith.constant 0 : index
    %c0_110 = arith.constant 0 : index
    %103 = vector.load %arg1[%c2_108, %c0_109, %c0_110] : memref<4x16x128xf32, #tpu.memory_space<vmem>>, vector<1x16x128xf32>
    %104 = vector.shape_cast %103 : vector<1x16x128xf32> to vector<16x128xf32>
    %105 = arith.addf %102, %104 : vector<16x128xf32>
    %cst_111 = arith.constant 0.000000e+00 : f32
    %106 = vector.broadcast %cst_111 : f32 to vector<16x128xf32>
    %107 = arith.maximumf %105, %106 : vector<16x128xf32>
    %c2_112 = arith.constant 2 : index
    %c0_113 = arith.constant 0 : index
    %c0_114 = arith.constant 0 : index
    %108 = vector.load %arg6[%c2_112, %c0_113, %c0_114] : memref<4x16x128xf32, #tpu.memory_space<vmem>>, vector<1x16x128xf32>
    %109 = vector.shape_cast %108 : vector<1x16x128xf32> to vector<16x128xf32>
    %110 = vector.shape_cast %107 : vector<16x128xf32> to vector<1x16x128xf32>
    tpu.vector_store %arg6[%c2_112, %c0_113, %c0_114], %110 {strides = array<i32>} : memref<4x16x128xf32, #tpu.memory_space<vmem>>, vector<1x16x128xf32>,
    %111 = vector.extract_strided_slice %74 {offsets = [54, 0], sizes = [16, 128], strides = [1, 1]} : vector<70x128xf32> to vector<16x128xf32>
    %c0_115 = arith.constant 0 : index
    %c0_116 = arith.constant 0 : index
    %112 = vector.load %arg5[%c0_115, %c0_116] : memref<1x128xf32, #tpu.memory_space<vmem>>, vector<1x128xf32>
    %113 = vector.broadcast %112 : vector<1x128xf32> to vector<16x128xf32>
    %114 = arith.addf %111, %113 : vector<16x128xf32>
    %c3_117 = arith.constant 3 : index
    %c0_118 = arith.constant 0 : index
    %c0_119 = arith.constant 0 : index
    %115 = vector.load %arg1[%c3_117, %c0_118, %c0_119] : memref<4x16x128xf32, #tpu.memory_space<vmem>>, vector<1x16x128xf32>
    %116 = vector.shape_cast %115 : vector<1x16x128xf32> to vector<16x128xf32>
    %117 = arith.addf %114, %116 : vector<16x128xf32>
    %cst_120 = arith.constant 0.000000e+00 : f32
    %118 = vector.broadcast %cst_120 : f32 to vector<16x128xf32>
    %119 = arith.maximumf %117, %118 : vector<16x128xf32>
    %c3_121 = arith.constant 3 : index
    %c0_122 = arith.constant 0 : index
    %c0_123 = arith.constant 0 : index
    %120 = vector.load %arg6[%c3_121, %c0_122, %c0_123] : memref<4x16x128xf32, #tpu.memory_space<vmem>>, vector<1x16x128xf32>
    %121 = vector.shape_cast %120 : vector<1x16x128xf32> to vector<16x128xf32>
    %122 = vector.shape_cast %119 : vector<16x128xf32> to vector<1x16x128xf32>
    tpu.vector_store %arg6[%c3_121, %c0_122, %c0_123], %122 {strides = array<i32>} : memref<4x16x128xf32, #tpu.memory_space<vmem>>, vector<1x16x128xf32>,
    return
  }
  func.func @transform_0(%arg0: i32) -> (i32, i32, i32) {
    %c0_i32 = arith.constant 0 : i32
    %c0_i32_0 = arith.constant 0 : i32
    %c0_i32_1 = arith.constant 0 : i32
    return %arg0, %c0_i32, %c0_i32_0 : i32, i32, i32
  }
  func.func @transform_1(%arg0: i32) -> (i32, i32, i32) {
    %c0_i32 = arith.constant 0 : i32
    %c0_i32_0 = arith.constant 0 : i32
    %c0_i32_1 = arith.constant 0 : i32
    %c0_i32_2 = arith.constant 0 : i32
    return %c0_i32, %c0_i32_0, %c0_i32_1 : i32, i32, i32
  }
  func.func @transform_2(%arg0: i32) -> (i32, i32) {
    %c0_i32 = arith.constant 0 : i32
    %c0_i32_0 = arith.constant 0 : i32
    %c0_i32_1 = arith.constant 0 : i32
    return %c0_i32, %c0_i32_0 : i32, i32
  }
  func.func @transform_3(%arg0: i32) -> (i32, i32, i32) {
    %c0_i32 = arith.constant 0 : i32
    %c0_i32_0 = arith.constant 0 : i32
    %c0_i32_1 = arith.constant 0 : i32
    %c0_i32_2 = arith.constant 0 : i32
    return %c0_i32, %c0_i32_0, %c0_i32_1 : i32, i32, i32
  }
  func.func @transform_4(%arg0: i32) -> (i32, i32) {
    %c0_i32 = arith.constant 0 : i32
    %c0_i32_0 = arith.constant 0 : i32
    %c0_i32_1 = arith.constant 0 : i32
    return %c0_i32, %c0_i32_0 : i32, i32
  }
  func.func @transform_5(%arg0: i32) -> (i32, i32, i32) {
    %c0_i32 = arith.constant 0 : i32
    %c0_i32_0 = arith.constant 0 : i32
    %c0_i32_1 = arith.constant 0 : i32
    return %arg0, %c0_i32, %c0_i32_0 : i32, i32, i32
  }
}

</mosaic_0001>

<bundles_post_ra>
// kernel: tpu_custom_call.1
= control target key start
LH: loop header
LB: loop body
LE: loop exit
PB: predicated region body
PF: predicated region fallthrough
CT: control target
= control target key end

     0   :  { %10 = vsyncpa [#allocation5], 0  ;;  %s2749_s0 = inlined_call_operand.hbm [shape: f32[8,16,128], index: 0, kind: input, shape index: {}]   ;;  %s2750_s1 = inlined_call_operand.hbm [shape: f32[3,128,128], index: 1, kind: input, shape index: {}]   ;;  %s2751_s2 = inlined_call_operand.vmem [shape: f32[1,128], index: 2, kind: input, shape index: {}]   ;;  %s2752_s3 = inlined_call_operand.hbm [shape: f32[3,128,128], index: 3, kind: input, shape index: {}]   ;;  %s2753_s4 = inlined_call_operand.vmem [shape: f32[1,128], index: 4, kind: input, shape index: {}]   ;;  %s2754_s5 = inlined_call_operand.hbm [shape: f32[8,16,128], index: 5, kind: output, shape index: {}]  }
   0x1   :  { %12 = vsyncpa [#allocation5 + $0x1], 0 }
   0x2   :  { %13 = vsyncpa [#allocation8], 0 }
   0x3   :  { %14 = vsyncpa [#allocation6], 0 }
   0x4   :  { %16 = vsyncpa [#allocation6 + $0x1], 0  ;;  %s2218_s18 = smov 0   ;;  %s2220_s19 = smov 0  }
   0x5   :  { %s2222_s20 = smov 0   ;;  %s2224_s21 = smov 0  }
   0x6 LB: > { %s2239_s22 = sadd.s32 4294967295, %s2176_s21   ;;  %s1395_s23 = sadd.s32 4294967294, %s2176_s21   ;;  %s2176_s21 = sphi %s2224_s21, %s2777_s21   ;;  %s2172_s20 = sphi %s2222_s20, %s2776_s20   ;;  %s2168_s19 = sphi %s2220_s19, %s2775_s19   ;;  %s2164_s18 = sphi %s2218_s18, %s2774_s18  }
   0x7   : > { %p42_p0 = scmp.ne.s32.totalorder %s2168_s19, %s2164_s18  ;;  %p2755_p1 = scmp.eq.s32.totalorder %s2239_s22, 0 }
   0x8   : > { %p150_p2 = scmp.eq.s32.totalorder %s2239_s22, 1  ;;  %p156_p3 = scmp.eq.s32.totalorder %s1395_s23, 1 }
   0x9   : > { %p2248_p4 = por %p2755_p1, %p42_p0  ;;  %p1396_p5 = scmp.ge.s32.totalorder %s2176_s21, 1 }
   0xa   : > { %p2253_p6 = por %p156_p3, %p42_p0  ;;  %p163_p7 = scmp.lt.s32.totalorder %s2176_s21, 3 }
   0xb   : > { %s2760_s24 = scalar_select %p2248_p4, 1, 0 }
   0xc   : > { %s2761_s25 = scalar_select %p2253_p6, 1, 0 }
   0xd   : > { %p2258_p8 = pnand %p1396_p5, %p163_p7  ;;  %s2178_s27 = smov [#allocation7]  }
   0xe   : > { %s175_s28 = sshll.u32 %s2178_s27, 4  ;;  %s2179_s30 = smov [#allocation9]   ;;  %s176_s28 = int_to_ptr.vmem [resolvable:$true] %s175_s28 }
   0xf   : > { %s2762_s26 = scalar_select %p2258_p8, 1, 0 }
  0x10   : > { %p1961_p9 = pneg %p2258_p8  ;;  %s191_s6 = sshll.u32 %s2179_s30, 4  ;;  %s192_s6 = int_to_ptr.vmem [resolvable:$true] %s191_s6 }
  0x11   : > { %s2039_s7 = scalar_lea.vmem %s176_s28, 6144  ;;  %p2047_p5 = scmp.lt.s32.totalorder %s176_s28, %s176_s28 }
  0x12   : > { %p2267_p11 = pnand %p1961_p9, %p2755_p1  ;;  %p2040_p13 = scmp.ne.s32.totalorder %s176_s28, %s2039_s7 }
  0x13   : > { %p2048_p7 = scmp.lt.s32.totalorder %s2039_s7, %s2039_s7 }
  0x14   : > { %p2030_p12 = pneg %p2267_p11 }
  0x15   : > { %p2049_p10 = por %p2048_p7, %p2047_p5 }
  0x16   : > { %p2042_p0 = pnand %p2040_p13, %p2030_p12 }
  0x18   : > { %p2043_p3 = pneg %p2042_p0 }
  0x1a   : > { %p2050_p9 = pnand %p2049_p10, %p2043_p3 }
  0x1c   : > { %2053 = shalt.err (!%p2050_p9)
}
  0x1d   : > { %s2756_s8 = smov 128   ;;  %s2181_s9 = smov 8  }
  0x1e   : > { %1964 = dma.hbm_to_vmem [thread:$0]  (!%p2267_p11), %s2750_s1, 6144, %s176_s28, [#allocation8], %s2756_s8, %s2756_s8, %s2181_s9  }
  0x1f   : > { %s2065_s12 = scalar_lea.vmem %s192_s6, 6144  ;;  %p2073_p10 = scmp.lt.s32.totalorder %s192_s6, %s192_s6 }
  0x20   : > { %p2066_p13 = scmp.ne.s32.totalorder %s192_s6, %s2065_s12  ;;  %p2074_p3 = scmp.lt.s32.totalorder %s2065_s12, %s2065_s12 }
  0x22   : > { %p2068_p0 = pnand %p2066_p13, %p2030_p12  ;;  %p2075_p7 = por %p2074_p3, %p2073_p10 }
  0x24   : > { %p2069_p5 = pneg %p2068_p0 }
  0x26   : > { %p2076_p9 = pnand %p2075_p7, %p2069_p5 }
  0x28   : > { %2079 = shalt.err (!%p2076_p9)
}
  0x29   : > { %1967 = dma.hbm_to_vmem [thread:$0]  (!%p2267_p11), %s2752_s3, 6144, %s192_s6, [#allocation8], %s2756_s8, %s2756_s8, %s2181_s9  }
  0x2a   : > { %s2296_s15 = sadd.s32 1, %s2176_s21   ;;  %s29_s16 = sadd.s32 1, %s2172_s20 }
  0x2b   : > { %s26_s17 = ssub.s32 %s2176_s21, %s2296_s15  ;;  %p36_p12 = scmp.ne.s32.totalorder %s2172_s20, %s2168_s19 }
  0x2c   : > { %p27_p13 = scmp.eq.s32.totalorder %s26_s17, 0  ;;  %p37_p0 = scmp.eq.s32.totalorder %s2176_s21, 0 }
  0x2d   : > { %p2306_p5 = por %p150_p2, %p36_p12  ;;  %p1978_p10 = scmp.lt.s32.totalorder %s2176_s21, 2 }
  0x2e   : > { %s2312_s27 = scalar_select %p27_p13, %s2172_s20, %s29_s16  }
  0x2f   : > { %s2764_s23 = scalar_select %p2306_p5, 1, 0 }
  0x30   : > { %p38_p3 = por %p37_p0, %p36_p12  ;;  %s208_s28 = sand.u32 1, %s2172_s20  }
  0x31   : > { %s1400_s29 = sshll.u32 %s208_s28, 6  ;;  %s1442_s30 = sshll.u32 %s2176_s21, 10 }
  0x32   : > { %s2319_s10 = scalar_lea.hbm %s2749_s0, %s1442_s30  ;;  %s212_s11 = scalar_lea.vmem [#allocation4], %s1400_s29 }
  0x33   : > { %s220_s12 = sshll.u32 %s212_s11, 4  ;;  %p2323_p2 = pnand %p1978_p10, %p38_p3  ;;  %s2321_s12 = int_to_ptr.vmem [resolvable:$true] %s220_s12 }
  0x34   : > { %s2327_s14 = scalar_lea.sflag [#allocation5], %s208_s28  ;;  %s2080_s16 = scalar_lea.hbm %s2319_s10, 1024 }
  0x35   : > { %p2081_p11 = scmp.ne.s32.totalorder %s2319_s10, %s2080_s16  ;;  %p2082_p7 = pneg %p2323_p2 }
  0x36   : > { %s2085_s29 = scalar_lea.hbm %s2749_s0, 2048  ;;  %p2086_p13 = scmp.lt.s32.totalorder %s2319_s10, %s2749_s0 }
  0x37   : > { %p2083_p9 = pnand %p2082_p7, %p2081_p11  ;;  %p2087_p0 = scmp.lt.s32.totalorder %s2085_s29, %s2080_s16 }
  0x39   : > { %p2084_p12 = pneg %p2083_p9  ;;  %p2088_p10 = por %p2087_p0, %p2086_p13 }
  0x3b   : > { %p2089_p3 = pnand %p2088_p10, %p2084_p12 }
  0x3d   : > { %2092 = shalt.err (!%p2089_p3)
}
  0x3e   : > { %s2093_s28 = scalar_lea.vmem %s2321_s12, 1024  ;;  %s2182_s11 = smov [#allocation4]  }
  0x3f   : > { %p2094_p1 = scmp.ne.s32.totalorder %s2321_s12, %s2093_s28  ;;  %s2098_s8 = sshll.u32 %s2182_s11, 4  ;;  %s2099_s8 = int_to_ptr.vmem [resolvable:$false] %s2098_s8 }
  0x40   : > { %s2100_s17 = scalar_lea.vmem %s2099_s8, 2048  ;;  %p2101_p9 = scmp.lt.s32.totalorder %s2321_s12, %s2099_s8 }
  0x41   : > { %p2096_p6 = pnand %p2094_p1, %p2082_p7  ;;  %p2102_p5 = scmp.lt.s32.totalorder %s2100_s17, %s2093_s28 }
  0x43   : > { %p2097_p11 = pneg %p2096_p6  ;;  %p2103_p4 = por %p2102_p5, %p2101_p9 }
  0x45   : > { %p2104_p8 = pnand %p2103_p4, %p2097_p11 }
  0x47   : > { %2107 = shalt.err (!%p2104_p8)
}
  0x48   : > { %s2766_s16 = smov 128   ;;  %p2767_p1 = scmp.ne.s32.totalorder %s2762_s26, 0 }
  0x49   : > { %1971 = dma.hbm_to_vmem [thread:$0]  (!%p2323_p2), %s2319_s10, 1024, %s2321_s12, %s2327_s14, %s2766_s16, %s2766_s16, %s2181_s9  }
  0x4a   : > { %232 = sbr.rel (%p2767_p1) target bundleno = 643 (0x283), region = 40  ;;  %s2354_s30 = sand.u32 (!%p2767_p1), 1, %s2168_s19  }
  0x4b   : > { %s1405_s8 = sshll.u32 (!%p2767_p1), %s2354_s30, 6  ;;  %s235_s29 = scalar_lea.sflag (!%p2767_p1), [#allocation5], %s2354_s30 }
  0x4c   : > { %s2360_s13 = scalar_lea.vmem (!%p2767_p1), [#allocation4], %s1405_s8  ;;  %p2768_p4 = scmp.ne.s32.totalorder (!%p2767_p1), %s2760_s24, 0 }
  0x4f   : > { %2151 = dma.done.wait (%p2768_p4), %s235_s29, 1024  }
  0x50   : > { %2153 = vsyncadd (%p2768_p4), %s235_s29, 4294966272  ;;  %p2769_p6 = scmp.eq.s32.totalorder %s2239_s22, 0 }
  0x52   : > { %2155 = dma.done.wait (%p2769_p6), [#allocation8], 12288   ;;  %p2770_p8 = pmov %p2769_p6 }
  0x53   : > { %v2183_v0 = vmov 0.0   ;;  %vm2184_vm0 = vmmov 0   ;;  %v360_v1 = vld [vmem:[#allocation7 + $0xf8] sm:$0xff]  ;;  %v359_v3 = vld [vmem:[#allocation7 + $0xf0] sm:$0xff]  ;;  %v358_v5 = vld [vmem:[#allocation7 + $0xe8] sm:$0xff]  ;;  %s2671_s12 = scalar_lea.vmem [#allocation10], %s1405_s8 }
  0x54   : > { %2157 = vsyncadd (%p2770_p8), [#allocation8], 4294955008  ;;  %1595 = vmatprep.subr.mxu0 %v2183_v0  ;;  %275 = vst [vmem:[#allocation2] sm:$0x1] %v2183_v0  ;;  %1654 = vmatprep.subr.mxu1 %v2183_v0  ;;  %v334_v2 = vld [vmem:[#allocation7 + $0x78] sm:$0xff]  ;;  %v333_v4 = vld [vmem:[#allocation7 + $0x70] sm:$0xff] }
  0x55   : > { %276 = vst [vmem:[#allocation2 + $0x11] sm:$0x1] %v2183_v0  ;;  %277 = vst [vmem:[#allocation3] sm:$0x1] %v2183_v0  ;;  %1627 = vmatprep.mubr.msk.f32.mxu0 %vm2184_vm0, %v2183_v0  ;;  %1686 = vmatprep.mubr.msk.f32.mxu1 %vm2184_vm0, %v2183_v0  ;;  %v332_v6 = vld [vmem:[#allocation7 + $0x68] sm:$0xff]  ;;  %v357_v7 = vld [vmem:[#allocation7 + $0xe0] sm:$0xff] }
  0x56   : > { %278 = vst [vmem:[#allocation3 + $0x11] sm:$0x1] %v2183_v0  ;;  %283 = vst [vmem:[#allocation2 + $0x12] sm:$0x1] %v2183_v0  ;;  %1596 = vmatpush3.msra.mxu0 %v360_v1  ;;  %1655 = vmatpush3.msra.mxu1 %v334_v2  ;;  %v331_v8 = vld [vmem:[#allocation7 + $0x60] sm:$0xff]  ;;  %v356_v9 = vld [vmem:[#allocation7 + $0xd8] sm:$0xff] }
  0x57   : > { %284 = vst [vmem:[#allocation2 + $0x23] sm:$0x1] %v2183_v0  ;;  %285 = vst [vmem:[#allocation3 + $0x12] sm:$0x1] %v2183_v0  ;;  %1597 = vmatprep.subr.mxu0 %v2183_v0  ;;  %1656 = vmatprep.subr.mxu1 %v2183_v0  ;;  %v330_v10 = vld [vmem:[#allocation7 + $0x58] sm:$0xff]  ;;  %v355_v11 = vld [vmem:[#allocation7 + $0xd0] sm:$0xff] }
  0x58   : > { %286 = vst [vmem:[#allocation3 + $0x23] sm:$0x1] %v2183_v0  ;;  %292 = vst [vmem:[#allocation2 + $0x24] sm:$0x1] %v2183_v0  ;;  %1598 = vmatpush3.msra.mxu0 %v359_v3  ;;  %1657 = vmatpush3.msra.mxu1 %v333_v4  ;;  %v329_v12 = vld [vmem:[#allocation7 + $0x50] sm:$0xff]  ;;  %v354_v13 = vld [vmem:[#allocation7 + $0xc8] sm:$0xff] }
  0x59   : > { %293 = vst [vmem:[#allocation2 + $0x35] sm:$0x1] %v2183_v0  ;;  %294 = vst [vmem:[#allocation3 + $0x24] sm:$0x1] %v2183_v0  ;;  %1599 = vmatprep.subr.mxu0 %v2183_v0  ;;  %1658 = vmatprep.subr.mxu1 %v2183_v0  ;;  %v328_v14 = vld [vmem:[#allocation7 + $0x48] sm:$0xff]  ;;  %v2403_v15 = vld [vmem:[%s2360_s13] sm:$0xff] }
  0x5a   : > { %295 = vst [vmem:[#allocation3 + $0x35] sm:$0x1] %v2183_v0  ;;  %301 = vst [vmem:[#allocation2 + $0x36] sm:$0x1] %v2183_v0  ;;  %1600 = vmatpush3.msra.mxu0 %v358_v5  ;;  %1659 = vmatpush3.msra.mxu1 %v332_v6  ;;  %v2407_v16 = vld [vmem:[%s2360_s13 + $0x8] sm:$0xff]  ;;  %v353_v17 = vld [vmem:[#allocation7 + $0xc0] sm:$0xff] }
  0x5b   : > { %302 = vst [vmem:[#allocation2 + $0x47] sm:$0x1] %v2183_v0  ;;  %303 = vst [vmem:[#allocation3 + $0x36] sm:$0x1] %v2183_v0  ;;  %1601 = vmatprep.subr.mxu0 %v2183_v0  ;;  %1660 = vmatprep.subr.mxu1 %v2183_v0  ;;  %v327_v18 = vld [vmem:[#allocation7 + $0x40] sm:$0xff]  ;;  %v1409_v19 = vld [vmem:[%s2360_s13 + $0x10] sm:$0xff] }
  0x5c   : > { %304 = vst [vmem:[#allocation3 + $0x47] sm:$0x1] %v2183_v0  ;;  %1602 = vmatpush3.msra.mxu0 %v357_v7  ;;  %1661 = vmatpush3.msra.mxu1 %v331_v8  ;;  %281 = vst [vmem:[#allocation2 + $0x1] sm:$0xff] %v2403_v15  ;;  %v1410_v20 = vld [vmem:[%s2360_s13 + $0x18] sm:$0xff]  ;;  %v1411_v23 = vld [vmem:[%s2360_s13 + $0x20] sm:$0xff]  ;;  %vm1209_vm1 = vcmask 1041408  }
  0x5d   : > { %1603 = vmatprep.subr.mxu0 %v2183_v0  ;;  %1662 = vmatprep.subr.mxu1 %v2183_v0  ;;  %282 = vst [vmem:[#allocation2 + $0x9] sm:$0xff] %v2407_v16  ;;  %290 = vst [vmem:[#allocation2 + $0x13] sm:$0xff] %v1409_v19  ;;  %v352_v21 = vld [vmem:[#allocation7 + $0xb8] sm:$0xff]  ;;  %v1412_v24 = vld [vmem:[%s2360_s13 + $0x28] sm:$0xff]  ;;  %vm1240_vm2 = vcmask 1043456   ;;  %vm1271_vm3 = vcmask 1045504  }
  0x5e   : > { %1604 = vmatpush3.msra.mxu0 %v356_v9  ;;  %1663 = vmatpush3.msra.mxu1 %v330_v10  ;;  %v326_v22 = vld [vmem:[#allocation7 + $0x38] sm:$0xff]  ;;  %291 = vst [vmem:[#allocation2 + $0x1b] sm:$0xff] %v1410_v20  ;;  %299 = vst [vmem:[#allocation2 + $0x25] sm:$0xff] %v1411_v23  ;;  %v351_v25 = vld [vmem:[#allocation7 + $0xb0] sm:$0xff]  ;;  %s1444_s14 = sshll.u32 %s2239_s22, 10  ;;  %s1303_s6 = sshll.u32 %s2671_s12, 4  ;;  %s2705_s6 = int_to_ptr.vmem [resolvable:$true] %s1303_s6 }
  0x5f   : > { %1605 = vmatprep.subr.mxu0 %v2183_v0  ;;  %1664 = vmatprep.subr.mxu1 %v2183_v0  ;;  %v325_v26 = vld [vmem:[#allocation7 + $0x30] sm:$0xff]  ;;  %300 = vst [vmem:[#allocation2 + $0x2d] sm:$0xff] %v1412_v24  ;;  %v1414_v28 = vld [vmem:[%s2360_s13 + $0x38] sm:$0xff]  ;;  %v350_v29 = vld [vmem:[#allocation7 + $0xa8] sm:$0xff]  ;;  %s2703_s11 = scalar_lea.hbm %s2754_s5, %s1444_s14  ;;  %s1289_s17 = scalar_lea.sflag [#allocation6], %s2354_s30 }
  0x60   : > { %1606 = vmatpush3.msra.mxu0 %v355_v11  ;;  %1665 = vmatpush3.msra.mxu1 %v329_v12  ;;  %v1413_v27 = vld [vmem:[%s2360_s13 + $0x30] sm:$0xff]  ;;  %v324_v30 = vld [vmem:[#allocation7 + $0x28] sm:$0xff]  ;;  %309 = vst [vmem:[#allocation2 + $0x3f] sm:$0xff] %v1414_v28  ;;  %v349_v31 = vld [vmem:[#allocation7 + $0xa0] sm:$0xff]  ;;  %s2108_s16 = scalar_lea.vmem %s2705_s6, 1024  ;;  %p2771_p2 = scmp.ne.s32.totalorder %s2764_s23, 0 }
  0x61   : > { %1607 = vmatprep.subr.mxu0 %v2183_v0  ;;  %1666 = vmatprep.subr.mxu1 %v2183_v0  ;;  %308 = vst [vmem:[#allocation2 + $0x37] sm:$0xff] %v1413_v27  ;;  %v323_v32 = vld [vmem:[#allocation7 + $0x20] sm:$0xff]  ;;  %v348_v33 = vld [vmem:[#allocation7 + $0x98] sm:$0xff]  ;;  %v347_v35 = vld [vmem:[#allocation7 + $0x90] sm:$0xff]  ;;  %p2109_p5 = scmp.ne.s32.totalorder %s2705_s6, %s2108_s16  ;;  %s2185_s22 = smov [#allocation10]  }
  0x62   : > { %1608 = vmatpush3.msra.mxu0 %v354_v13  ;;  %1667 = vmatpush3.msra.mxu1 %v328_v14  ;;  %v322_v34 = vld [vmem:[#allocation7 + $0x18] sm:$0xff]  ;;  %v321_v36 = vld [vmem:[#allocation7 + $0x10] sm:$0xff]  ;;  %v346_v37 = vld [vmem:[#allocation7 + $0x88] sm:$0xff]  ;;  %s2112_s8 = sshll.u32 %s2185_s22, 4  ;;  %s2113_s8 = int_to_ptr.vmem [resolvable:$false] %s2112_s8 }
  0x63   : > { %1609 = vmatprep.subr.mxu0 %v2183_v0  ;;  %1668 = vmatprep.subr.mxu1 %v2183_v0  ;;  %v320_v38 = vld [vmem:[#allocation7 + $0x8] sm:$0xff]  ;;  %v345_v39 = vld [vmem:[#allocation7 + $0x80] sm:$0xff]  ;;  %v310_v41 = vld [vmem:[#allocation2] sm:$0xff]  ;;  %p2110_p7 = pnand %p2109_p5, %p2771_p2  ;;  %s2114_s29 = scalar_lea.vmem %s2113_s8, 2048 }
  0x64   : > { %1610 = vmatpush3.msra.mxu0 %v353_v17  ;;  %1669 = vmatpush3.msra.mxu1 %v327_v18  ;;  %v319_v40 = vld [vmem:[#allocation7] sm:$0xff]  ;;  %v606_v42 = vld [vmem:[#allocation7 + $0x178] sm:$0xff]  ;;  %v605_v43 = vld [vmem:[#allocation7 + $0x170] sm:$0xff]  ;;  %p2115_p13 = scmp.lt.s32.totalorder %s2705_s6, %s2113_s8  ;;  %p2116_p0 = scmp.lt.s32.totalorder %s2114_s29, %s2108_s16 }
  0x65   : > { %1611 = vmatprep.subr.mxu0 %v2183_v0  ;;  %1670 = vmatprep.subr.mxu1 %v2183_v0  ;;  %v311_v44 = vld [vmem:[#allocation2 + $0x8] sm:$0xff]  ;;  %v604_v45 = vld [vmem:[#allocation7 + $0x168] sm:$0xff]  ;;  %v603_v46 = vld [vmem:[#allocation7 + $0x160] sm:$0xff]  ;;  %p2111_p12 = pneg %p2110_p7 }
  0x66   : > { %1612 = vmatpush3.msra.mxu0 %v352_v21  ;;  %1671 = vmatpush3.msra.mxu1 %v326_v22  ;;  %v337_v47 = vld [vmem:[#allocation2 + $0x11] sm:$0xff]  ;;  %v602_v49 = vld [vmem:[#allocation7 + $0x158] sm:$0xff]  ;;  %v338_v50 = vld [vmem:[#allocation2 + $0x19] sm:$0xff]  ;;  %p2117_p10 = por %p2116_p0, %p2115_p13 }
  0x67   : > { %1613 = vmatprep.subr.mxu0 %v2183_v0  ;;  %1672 = vmatprep.subr.mxu1 %v2183_v0  ;;  %v312_v48 = vld [vmem:[#allocation2 + $0x10] sm:$0xff]  ;;  %v313_v51 = vld [vmem:[#allocation2 + $0x18] sm:$0xff]  ;;  %v601_v52 = vld [vmem:[#allocation7 + $0x150] sm:$0xff] }
  0x68   : > { %1614 = vmatpush3.msra.mxu0 %v351_v25  ;;  %1673 = vmatpush3.msra.mxu1 %v325_v26  ;;  %v600_v53 = vld [vmem:[#allocation7 + $0x148] sm:$0xff]  ;;  %v339_v54 = vld [vmem:[#allocation2 + $0x21] sm:$0xff]  ;;  %v599_v56 = vld [vmem:[#allocation7 + $0x140] sm:$0xff]  ;;  %p2118_p3 = pnand %p2117_p10, %p2111_p12 }
  0x69   : > { %1615 = vmatprep.subr.mxu0 %v2183_v0  ;;  %1674 = vmatprep.subr.mxu1 %v2183_v0  ;;  %v314_v55 = vld [vmem:[#allocation2 + $0x20] sm:$0xff]  ;;  %v598_v57 = vld [vmem:[#allocation7 + $0x138] sm:$0xff]  ;;  %v596_v61 = vld [vmem:[#allocation7 + $0x128] sm:$0xff] }
  0x6a   : > { %1616 = vmatpush3.msra.mxu0 %v350_v29  ;;  %1675 = vmatpush3.msra.mxu1 %v324_v30  ;;  %v340_v58 = vld [vmem:[#allocation2 + $0x29] sm:$0xff]  ;;  %v597_v60 = vld [vmem:[#allocation7 + $0x130] sm:$0xff]  ;;  %v341_v62 = vld [vmem:[#allocation2 + $0x31] sm:$0xff] }
  0x6b   : > { %1617 = vmatprep.subr.mxu0 %v2183_v0  ;;  %1676 = vmatprep.subr.mxu1 %v2183_v0  ;;  %v315_v59 = vld [vmem:[#allocation2 + $0x28] sm:$0xff]  ;;  %v316_v63 = vld [vmem:[#allocation2 + $0x30] sm:$0xff]  ;;  %v342_v3 = vld [vmem:[#allocation2 + $0x39] sm:$0xff] }
  0x6c   : > { %1618 = vmatpush3.msra.mxu0 %v349_v31  ;;  %1677 = vmatpush3.msra.mxu1 %v323_v32  ;;  %v595_v1 = vld [vmem:[#allocation7 + $0x120] sm:$0xff]  ;;  %v594_v2 = vld [vmem:[#allocation7 + $0x118] sm:$0xff]  ;;  %v317_v4 = vld [vmem:[#allocation2 + $0x38] sm:$0xff] }
  0x6d   : > { %1619 = vmatprep.subr.mxu0 %v2183_v0  ;;  %1678 = vmatprep.subr.mxu1 %v2183_v0  ;;  %v593_v5 = vld [vmem:[#allocation7 + $0x110] sm:$0xff]  ;;  %v592_v8 = vld [vmem:[#allocation7 + $0x108] sm:$0xff]  ;;  %v591_v9 = vld [vmem:[#allocation7 + $0x100] sm:$0xff] }
  0x6e   : > { %1620 = vmatpush3.msra.mxu0 %v348_v33  ;;  %1679 = vmatpush3.msra.mxu1 %v322_v34  ;;  %v343_v6 = vld [vmem:[#allocation2 + $0x41] sm:$0x3f]  ;;  %v582_v11 = vld [vmem:[#allocation2 + $0xa] sm:$0xff]  ;;  %v583_v12 = vld [vmem:[#allocation2 + $0x12] sm:$0xff] }
  0x6f   : > { %1621 = vmatprep.subr.mxu0 %v2183_v0  ;;  %1680 = vmatprep.subr.mxu1 %v2183_v0  ;;  %v318_v7 = vld [vmem:[#allocation2 + $0x40] sm:$0x3f]  ;;  %v812_v19 = vld [vmem:[#allocation9 + $0xf8] sm:$0xff]  ;;  %v810_v21 = vld [vmem:[#allocation9 + $0xe8] sm:$0xff] }
  0x70   : > { %1622 = vmatpush3.msra.mxu0 %v347_v35  ;;  %1681 = vmatpush3.msra.mxu1 %v321_v36  ;;  %v581_v10 = vld [vmem:[#allocation2 + $0x2] sm:$0xff]  ;;  %v584_v13 = vld [vmem:[#allocation2 + $0x1a] sm:$0xff]  ;;  %v809_v22 = vld [vmem:[#allocation9 + $0xe0] sm:$0xff] }
  0x71   : > { %1623 = vmatprep.subr.mxu0 %v2183_v0  ;;  %1682 = vmatprep.subr.mxu1 %v2183_v0  ;;  %v585_v14 = vld [vmem:[#allocation2 + $0x22] sm:$0xff]  ;;  %v588_v17 = vld [vmem:[#allocation2 + $0x3a] sm:$0xff]  ;;  %v783_v29 = vld [vmem:[#allocation9 + $0x60] sm:$0xff] }
  0x72   : > { %1624 = vmatpush3.msra.mxu0 %v346_v37  ;;  %1683 = vmatpush3.msra.mxu1 %v320_v38  ;;  %v589_v18 = vld [vmem:[#allocation2 + $0x42] sm:$0x3f]  ;;  %v786_v23 = vld [vmem:[#allocation9 + $0x78] sm:$0xff]  ;;  %v784_v27 = vld [vmem:[#allocation9 + $0x68] sm:$0xff] }
  0x73   : > { %1625 = vmatprep.subr.mxu0 %v2183_v0  ;;  %1684 = vmatprep.subr.mxu1 %v2183_v0  ;;  %v811_v20 = vld [vmem:[#allocation9 + $0xf0] sm:$0xff]  ;;  %v808_v24 = vld [vmem:[#allocation9 + $0xd8] sm:$0xff]  ;;  %v806_v28 = vld [vmem:[#allocation9 + $0xc8] sm:$0xff] }
  0x74   : > { %1626 = vmatpush3.msra.mxu0 %v345_v39  ;;  %1685 = vmatpush3.msra.mxu1 %v319_v40  ;;  %v785_v25 = vld [vmem:[#allocation9 + $0x70] sm:$0xff]  ;;  %v805_v30 = vld [vmem:[#allocation9 + $0xc0] sm:$0xff]  ;;  %v782_v31 = vld [vmem:[#allocation9 + $0x58] sm:$0xff] }
  0x75   : > { %1628 = vmatmul.mubr.f32.vlgmr.msra.gmra.mxu0 %v2403_v15  ;;  %1713 = vmatprep.subr.mxu0 %v2183_v0  ;;  %v586_v15 = vld [vmem:[#allocation2 + $0x2a] sm:$0xff]  ;;  %v807_v26 = vld [vmem:[#allocation9 + $0xd0] sm:$0xff]  ;;  %v780_v35 = vld [vmem:[#allocation9 + $0x48] sm:$0xff] }
  0x76   : > { %1687 = vmatmul.mubr.f32.vlgmr.msra.gmra.mxu1 %v310_v41  ;;  %1714 = vmatpush3.msra.mxu0 %v606_v42  ;;  %v804_v32 = vld [vmem:[#allocation9 + $0xb8] sm:$0xff]  ;;  %v781_v33 = vld [vmem:[#allocation9 + $0x50] sm:$0xff]  ;;  %v802_v36 = vld [vmem:[#allocation9 + $0xa8] sm:$0xff] }
  0x77   : > { %1630 = vmatprep.mubr.msk.f32.mxu0 %vm2184_vm0, %v2183_v0  ;;  %1715 = vmatprep.subr.mxu0 %v2183_v0  ;;  %v803_v34 = vld [vmem:[#allocation9 + $0xb0] sm:$0xff]  ;;  %v779_v37 = vld [vmem:[#allocation9 + $0x40] sm:$0xff]  ;;  %v778_v39 = vld [vmem:[#allocation9 + $0x38] sm:$0xff] }
  0x78   : > { %1689 = vmatprep.mubr.msk.f32.mxu1 %vm2184_vm0, %v2183_v0  ;;  %1716 = vmatpush3.msra.mxu0 %v605_v43  ;;  %v801_v38 = vld [vmem:[#allocation9 + $0xa0] sm:$0xff]  ;;  %v800_v40 = vld [vmem:[#allocation9 + $0x98] sm:$0xff]  ;;  %v777_v41 = vld [vmem:[#allocation9 + $0x30] sm:$0xff] }
  0x79   : > { %1631 = vmatmul.mubr.f32.gmra.mxu0 %v2407_v16  ;;  %1717 = vmatprep.subr.mxu0 %v2183_v0  ;;  %v587_v16 = vld [vmem:[#allocation2 + $0x32] sm:$0xff]  ;;  %v799_v42 = vld [vmem:[#allocation9 + $0x90] sm:$0xff] }
  0x7a   : > { %1690 = vmatmul.mubr.f32.gmra.mxu1 %v311_v44  ;;  %1718 = vmatpush3.msra.mxu0 %v604_v45  ;;  %v776_v43 = vld [vmem:[#allocation9 + $0x28] sm:$0xff]  ;;  %v775_v45 = vld [vmem:[#allocation9 + $0x20] sm:$0xff] }
  0x7b   : > { %1633 = vmatprep.mubr.msk.f32.mxu0 %vm2184_vm0, %v2183_v0  ;;  %1719 = vmatprep.subr.mxu0 %v2183_v0  ;;  %v798_v44 = vld [vmem:[#allocation9 + $0x88] sm:$0xff] }
  0x7c   : > { %1692 = vmatprep.mubr.msk.f32.mxu1 %vm2184_vm0, %v2183_v0  ;;  %1720 = vmatpush3.msra.mxu0 %v603_v46  ;;  %v797_v46 = vld [vmem:[#allocation9 + $0x80] sm:$0xff] }
  0x7d   : > { %1634 = vmatmul.mubr.f32.gmra.mxu0 %v337_v47  ;;  %1721 = vmatprep.subr.mxu0 %v2183_v0  ;;  %v774_v47 = vld [vmem:[#allocation9 + $0x18] sm:$0xff] }
  0x7e   : > { %1693 = vmatmul.mubr.f32.gmra.mxu1 %v312_v48  ;;  %1722 = vmatpush3.msra.mxu0 %v602_v49  ;;  %v773_v48 = vld [vmem:[#allocation9 + $0x10] sm:$0xff]  ;;  %v772_v49 = vld [vmem:[#allocation9 + $0x8] sm:$0xff] }
  0x7f   : > { %1636 = vmatprep.mubr.msk.f32.mxu0 %vm2184_vm0, %v2183_v0  ;;  %1695 = vmatprep.mubr.msk.f32.mxu1 %vm2184_vm0, %v2183_v0 }
  0x80   : > { %1723 = vmatprep.subr.mxu0 %v2183_v0  ;;  %1772 = vmatprep.subr.mxu1 %v2183_v0 }
  0x81   : > { %1637 = vmatmul.mubr.f32.gmra.mxu0 %v338_v50  ;;  %1773 = vmatpush3.msra.mxu1 %v812_v19  ;;  %v771_v50 = vld [vmem:[#allocation9] sm:$0xff] }
  0x82   : > { %1696 = vmatmul.mubr.f32.gmra.mxu1 %v313_v51  ;;  %1724 = vmatpush3.msra.mxu0 %v601_v52 }
  0x83   : > { %1725 = vmatprep.subr.mxu0 %v2183_v0  ;;  %1639 = vmatprep.mubr.msk.f32.mxu0 %vm2184_vm0, %v2183_v0 }
  0x84   : > { %1726 = vmatpush3.msra.mxu0 %v600_v53  ;;  %1698 = vmatprep.mubr.msk.f32.mxu1 %vm2184_vm0, %v2183_v0 }
  0x85   : > { %1640 = vmatmul.mubr.f32.gmra.mxu0 %v339_v54  ;;  %1727 = vmatprep.subr.mxu0 %v2183_v0 }
  0x86   : > { %1699 = vmatmul.mubr.f32.gmra.mxu1 %v314_v55  ;;  %1728 = vmatpush3.msra.mxu0 %v599_v56 }
  0x87   : > { %1729 = vmatprep.subr.mxu0 %v2183_v0  ;;  %1642 = vmatprep.mubr.msk.f32.mxu0 %vm2184_vm0, %v2183_v0 }
  0x88   : > { %1730 = vmatpush3.msra.mxu0 %v598_v57  ;;  %1701 = vmatprep.mubr.msk.f32.mxu1 %vm2184_vm0, %v2183_v0 }
  0x89   : > { %1643 = vmatmul.mubr.f32.gmra.mxu0 %v340_v58  ;;  %1731 = vmatprep.subr.mxu0 %v2183_v0 }
  0x8a   : > { %1702 = vmatmul.mubr.f32.gmra.mxu1 %v315_v59  ;;  %1732 = vmatpush3.msra.mxu0 %v597_v60 }
  0x8b   : > { %1645 = vmatprep.mubr.msk.f32.mxu0 %vm2184_vm0, %v2183_v0  ;;  %1733 = vmatprep.subr.mxu0 %v2183_v0 }
  0x8c   : > { %1704 = vmatprep.mubr.msk.f32.mxu1 %vm2184_vm0, %v2183_v0  ;;  %1734 = vmatpush3.msra.mxu0 %v596_v61 }
  0x8d   : > { %1646 = vmatmul.mubr.f32.gmra.mxu0 %v341_v62  ;;  %1735 = vmatprep.subr.mxu0 %v2183_v0 }
  0x8e   : > { %1705 = vmatmul.mubr.f32.gmra.mxu1 %v316_v63  ;;  %1736 = vmatpush3.msra.mxu0 %v595_v1 }
  0x8f   : > { %1648 = vmatprep.mubr.msk.f32.mxu0 %vm2184_vm0, %v2183_v0  ;;  %1737 = vmatprep.subr.mxu0 %v2183_v0 }
  0x90   : > { %1707 = vmatprep.mubr.msk.f32.mxu1 %vm2184_vm0, %v2183_v0  ;;  %1738 = vmatpush3.msra.mxu0 %v594_v2 }
  0x91   : > { %1649 = vmatmul.mubr.f32.gmra.mxu0 %v342_v3  ;;  %1739 = vmatprep.subr.mxu0 %v2183_v0 }
  0x92   : > { %1708 = vmatmul.mubr.f32.gmra.mxu1 %v317_v4  ;;  %1651 = vmatprep.mubr.msk.f32.mxu0 %vm2184_vm0, %v2183_v0 }
  0x93   : > { %1740 = vmatpush3.msra.mxu0 %v593_v5  ;;  %1710 = vmatprep.mubr.msk.f32.mxu1 %vm2184_vm0, %v2183_v0 }
  0x94   : > { %1741 = vmatprep.subr.mxu0 %v2183_v0  ;;  %1774 = vmatprep.subr.mxu1 %v2183_v0 }
  0x95   : > { %1652 = vmatmul.mubr.f32.gmra.mxu0 %v343_v6  ;;  %1775 = vmatpush3.msra.mxu1 %v811_v20 }
  0x96   : > { %1711 = vmatmul.mubr.f32.gmra.mxu1 %v318_v7  ;;  %1742 = vmatpush3.msra.mxu0 %v592_v8 }
  0x97   : > { %1743 = vmatprep.subr.mxu0 %v2183_v0  ;;  %1745 = vmatprep.mubr.msk.f32.mxu0 %vm2184_vm0, %v2183_v0 }
  0x98   : > { %1744 = vmatpush3.msra.mxu0 %v591_v9  ;;  %1804 = vmatprep.mubr.msk.f32.mxu1 %vm2184_vm0, %v2183_v0 }
  0x99   : > { %1746 = vmatmul.mubr.f32.vlgmr.msra.gmra.mxu0 %v581_v10  ;;  %1831 = vmatprep.subr.mxu0 %v2183_v0 }
  0x9a   : > { %1748 = vmatprep.mubr.msk.f32.mxu0 %vm2184_vm0, %v2183_v0  ;;  %1776 = vmatprep.subr.mxu1 %v2183_v0 }
  0x9b   : > { %1777 = vmatpush3.msra.mxu1 %v810_v21  ;;  %1832 = vmatpush3.msra.mxu0 %v786_v23 }
  0x9c   : > { %1778 = vmatprep.subr.mxu1 %v2183_v0  ;;  %1833 = vmatprep.subr.mxu0 %v2183_v0 }
  0x9d   : > { %1749 = vmatmul.mubr.f32.gmra.mxu0 %v582_v11  ;;  %1779 = vmatpush3.msra.mxu1 %v809_v22 }
  0x9e   : > { %1751 = vmatprep.mubr.msk.f32.mxu0 %vm2184_vm0, %v2183_v0  ;;  %1780 = vmatprep.subr.mxu1 %v2183_v0 }
  0x9f   : > { %1781 = vmatpush3.msra.mxu1 %v808_v24  ;;  %1834 = vmatpush3.msra.mxu0 %v785_v25 }
  0xa0   : > { %1782 = vmatprep.subr.mxu1 %v2183_v0  ;;  %1835 = vmatprep.subr.mxu0 %v2183_v0 }
  0xa1   : > { %1752 = vmatmul.mubr.f32.gmra.mxu0 %v583_v12  ;;  %1783 = vmatpush3.msra.mxu1 %v807_v26  ;;  %v2560_v26 = vld [vmem:[%s2751_s2] ss:$0 sm:$0xff] }
  0xa2   : > { %1754 = vmatprep.mubr.msk.f32.mxu0 %vm2184_vm0, %v2183_v0  ;;  %1784 = vmatprep.subr.mxu1 %v2183_v0 }
  0xa3   : > { %1836 = vmatpush3.msra.mxu0 %v784_v27  ;;  %1785 = vmatpush3.msra.mxu1 %v806_v28 }
  0xa4   : > { %1837 = vmatprep.subr.mxu0 %v2183_v0  ;;  %1786 = vmatprep.subr.mxu1 %v2183_v0 }
  0xa5   : > { %1755 = vmatmul.mubr.f32.gmra.mxu0 %v584_v13  ;;  %1787 = vmatpush3.msra.mxu1 %v805_v30 }
  0xa6   : > { %1757 = vmatprep.mubr.msk.f32.mxu0 %vm2184_vm0, %v2183_v0  ;;  %1838 = vmatpush3.msra.mxu0 %v783_v29 }
  0xa7   : > { %1839 = vmatprep.subr.mxu0 %v2183_v0  ;;  %1788 = vmatprep.subr.mxu1 %v2183_v0 }
  0xa8   : > { %1840 = vmatpush3.msra.mxu0 %v782_v31  ;;  %1789 = vmatpush3.msra.mxu1 %v804_v32 }
  0xa9   : > { %1758 = vmatmul.mubr.f32.gmra.mxu0 %v585_v14  ;;  %1841 = vmatprep.subr.mxu0 %v2183_v0 }
  0xaa   : > { %1760 = vmatprep.mubr.msk.f32.mxu0 %vm2184_vm0, %v2183_v0  ;;  %1790 = vmatprep.subr.mxu1 %v2183_v0 }
  0xab   : > { %1842 = vmatpush3.msra.mxu0 %v781_v33  ;;  %1791 = vmatpush3.msra.mxu1 %v803_v34  ;;  %v1058_v34 = vld [vmem:[#allocation9 + $0x178] sm:$0xff] }
  0xac   : > { %1843 = vmatprep.subr.mxu0 %v2183_v0  ;;  %1792 = vmatprep.subr.mxu1 %v2183_v0 }
  0xad   : > { %1761 = vmatmul.mubr.f32.gmra.mxu0 %v586_v15  ;;  %1793 = vmatpush3.msra.mxu1 %v802_v36 }
  0xae   : > { %1763 = vmatprep.mubr.msk.f32.mxu0 %vm2184_vm0, %v2183_v0  ;;  %1844 = vmatpush3.msra.mxu0 %v780_v35 }
  0xaf   : > { %1845 = vmatprep.subr.mxu0 %v2183_v0  ;;  %1794 = vmatprep.subr.mxu1 %v2183_v0 }
  0xb0   : > { %1846 = vmatpush3.msra.mxu0 %v779_v37  ;;  %1795 = vmatpush3.msra.mxu1 %v801_v38  ;;  %v1057_v38 = vld [vmem:[#allocation9 + $0x170] sm:$0xff] }
  0xb1   : > { %1764 = vmatmul.mubr.f32.gmra.mxu0 %v587_v16  ;;  %1847 = vmatprep.subr.mxu0 %v2183_v0 }
  0xb2   : > { %1766 = vmatprep.mubr.msk.f32.mxu0 %vm2184_vm0, %v2183_v0  ;;  %1796 = vmatprep.subr.mxu1 %v2183_v0 }
  0xb3   : > { %1848 = vmatpush3.msra.mxu0 %v778_v39  ;;  %1797 = vmatpush3.msra.mxu1 %v800_v40 }
  0xb4   : > { %1849 = vmatprep.subr.mxu0 %v2183_v0  ;;  %1798 = vmatprep.subr.mxu1 %v2183_v0 }
  0xb5   : > { %1767 = vmatmul.mubr.f32.gmra.mxu0 %v588_v17  ;;  %1799 = vmatpush3.msra.mxu1 %v799_v42  ;;  %v1056_v42 = vld [vmem:[#allocation9 + $0x168] sm:$0xff] }
  0xb6   : > { %1769 = vmatprep.mubr.msk.f32.mxu0 %vm2184_vm0, %v2183_v0  ;;  %1850 = vmatpush3.msra.mxu0 %v777_v41 }
  0xb7   : > { %1851 = vmatprep.subr.mxu0 %v2183_v0  ;;  %1800 = vmatprep.subr.mxu1 %v2183_v0 }
  0xb8   : > { %1852 = vmatpush3.msra.mxu0 %v776_v43  ;;  %1801 = vmatpush3.msra.mxu1 %v798_v44 }
  0xb9   : > { %1770 = vmatmul.mubr.f32.gmra.mxu0 %v589_v18  ;;  %1853 = vmatprep.subr.mxu0 %v2183_v0 }
  0xba   : > { %1863 = vmatprep.mubr.msk.f32.mxu0 %vm2184_vm0, %v2183_v0  ;;  %1802 = vmatprep.subr.mxu1 %v2183_v0 }
  0xbb   : > { %1854 = vmatpush3.msra.mxu0 %v775_v45  ;;  %1803 = vmatpush3.msra.mxu1 %v797_v46  ;;  %v1055_v46 = vld [vmem:[#allocation9 + $0x160] sm:$0xff] }
  0xbc   : > { %1855 = vmatprep.subr.mxu0 %v2183_v0  ;;  %1890 = vmatprep.subr.mxu1 %v2183_v0 }
  0xbd   : > { %1856 = vmatpush3.msra.mxu0 %v774_v47 }
  0xbe   : > { %1857 = vmatprep.subr.mxu0 %v2183_v0 }
  0xbf   : > { %1858 = vmatpush3.msra.mxu0 %v773_v48 }
  0xc0   : > { %1859 = vmatprep.subr.mxu0 %v2183_v0 }
  0xc1   : > { %1860 = vmatpush3.msra.mxu0 %v772_v49 }
  0xc2   : > { %1861 = vmatprep.subr.mxu0 %v2183_v0 }
  0xc3   : > { %1862 = vmatpush3.msra.mxu0 %v771_v50  ;;  %v1054_v50 = vld [vmem:[#allocation9 + $0x158] sm:$0xff] }
 0x135   : > { %v427_v51 = vpop.f32.mrf.mxu0 }
 0x136   : > { %v537_v52 = vpop.f32.mrf.mxu1 }
 0x137   : > { %v1629_v53 = vpop.f32.mrf.mxu0  ;;  %v538_v23 = vadd.f32 %v537_v52, %v427_v51 }
 0x138   : > { %v1688_v54 = vpop.f32.mrf.mxu1 }
 0x139   : > { %v432_v55 = vpop.f32.mrf.mxu0 }
 0x13a   : > { %v542_v56 = vpop.f32.mrf.mxu1 }
 0x13b   : > { %v1632_v57 = vpop.f32.mrf.mxu0  ;;  %v543_v29 = vadd.f32 %v542_v56, %v432_v55  ;;  %v1053_v55 = vld [vmem:[#allocation9 + $0x150] sm:$0xff] }
 0x13c   : > { %v1691_v58 = vpop.f32.mrf.mxu1 }
 0x13d   : > { %v437_v59 = vpop.f32.mrf.mxu0 }
 0x13e   : > { %v547_v60 = vpop.f32.mrf.mxu1 }
 0x13f   : > { %v1635_v61 = vpop.f32.mrf.mxu0  ;;  %v548_v36 = vadd.f32 %v547_v60, %v437_v59  ;;  %v1052_v59 = vld [vmem:[#allocation9 + $0x148] sm:$0xff] }
 0x140   : > { %v1694_v62 = vpop.f32.mrf.mxu1 }
 0x141   : > { %v442_v63 = vpop.f32.mrf.mxu0 }
 0x142   : > { %v552_v1 = vpop.f32.mrf.mxu1 }
 0x143   : > { %v1638_v2 = vpop.f32.mrf.mxu0  ;;  %v553_v44 = vadd.f32 %v552_v1, %v442_v63  ;;  %v1051_v1 = vld [vmem:[#allocation9 + $0x140] sm:$0xff] }
 0x144   : > { %v1697_v3 = vpop.f32.mrf.mxu1 }
 0x145   : > { %v447_v4 = vpop.f32.mrf.mxu0 }
 0x146   : > { %v557_v5 = vpop.f32.mrf.mxu1 }
 0x147   : > { %v1641_v6 = vpop.f32.mrf.mxu0  ;;  %v558_v53 = vadd.f32 %v557_v5, %v447_v4 }
 0x148   : > { %v1700_v7 = vpop.f32.mrf.mxu1 }
 0x149   : > { %v2541_v8 = vpop.f32.mrf.mxu0 }
 0x14a   : > { %v2543_v9 = vpop.f32.mrf.mxu1 }
 0x14b   : > { %v1644_v10 = vpop.f32.mrf.mxu0  ;;  %v563_v62 = vadd.f32 %v2543_v9, %v2541_v8 }
 0x14c   : > { %v1703_v11 = vpop.f32.mrf.mxu1  ;;  %v1050_v10 = vld [vmem:[#allocation9 + $0x138] sm:$0xff] }
 0x14d   : > { %v2545_v12 = vpop.f32.mrf.mxu0 }
 0x14e   : > { %v2547_v13 = vpop.f32.mrf.mxu1 }
 0x14f   : > { %v1647_v14 = vpop.f32.mrf.mxu0  ;;  %v568_v8 = vadd.f32 %v2547_v13, %v2545_v12 }
 0x150   : > { %v1706_v15 = vpop.f32.mrf.mxu1 }
 0x151   : > { %v2549_v16 = vpop.f32.mrf.mxu0 }
 0x152   : > { %v2551_v17 = vpop.f32.mrf.mxu1 }
 0x153   : > { %v1650_v18 = vpop.f32.mrf.mxu0  ;;  %v573_v12 = vadd.f32 %v2551_v17, %v2549_v16 }
 0x154   : > { %v1709_v19 = vpop.f32.mrf.mxu1 }
 0x155   : > { %v2553_v20 = vpop.f32.mrf.mxu0 }
 0x156   : > { %v2555_v21 = vpop.f32.mrf.mxu1 }
 0x157   : > { %v1653_v22 = vpop.f32.mrf.mxu0  ;;  %v578_v17 = vadd.f32 %v2555_v21, %v2553_v20  ;;  %v1047_v21 = vld [vmem:[#allocation9 + $0x120] sm:$0xff] }
 0x158   : > { %v1712_v24 = vpop.f32.mrf.mxu1  ;;  %v1049_v22 = vld [vmem:[#allocation9 + $0x130] sm:$0xff] }
 0x159   : > { %v673_v25 = vpop.f32.mrf.mxu0 }
 0x15a   : > { %v717_v27 = vadd.f32 %v673_v25, %v538_v23 }
 0x15b   : > { %v1747_v28 = vpop.f32.mrf.mxu0 }
 0x15c   : > { %v733_v30 = vadd.f32 %v2560_v26, %v717_v27 }
 0x15d   : > { %v678_v31 = vpop.f32.mrf.mxu0 }
 0x15e   : > { %v742_v32 = vmax.f32 %v733_v30, 0.0  ;;  %v718_v33 = vadd.f32 %v678_v31, %v543_v29  ;;  %v1048_v30 = vld [vmem:[#allocation9 + $0x128] sm:$0xff] }
 0x15f   : > { %v1750_v35 = vpop.f32.mrf.mxu0 }
 0x160   : > { %751 = vst [vmem:[#allocation3 + $0x1] sm:$0xff] %v742_v32  ;;  %v734_v37 = vadd.f32 %v2560_v26, %v718_v33  ;;  %1805 = vmatmul.mubr.f32.vlgmr.msra.gmra.mxu1 %v742_v32 }
 0x161   : > { %v683_v39 = vpop.f32.mrf.mxu0  ;;  %1891 = vmatpush3.msra.mxu1 %v1058_v34  ;;  %1807 = vmatprep.mubr.msk.f32.mxu1 %vm2184_vm0, %v2183_v0 }
 0x162   : > { %v743_v40 = vmax.f32 %v734_v37, 0.0  ;;  %v719_v41 = vadd.f32 %v683_v39, %v548_v36  ;;  %1892 = vmatprep.subr.mxu1 %v2183_v0  ;;  %v1046_v39 = vld [vmem:[#allocation9 + $0x118] sm:$0xff] }
 0x163   : > { %v1753_v43 = vpop.f32.mrf.mxu0  ;;  %1893 = vmatpush3.msra.mxu1 %v1057_v38 }
 0x164   : > { %752 = vst [vmem:[#allocation3 + $0x9] sm:$0xff] %v743_v40  ;;  %v735_v45 = vadd.f32 %v2560_v26, %v719_v41  ;;  %1808 = vmatmul.mubr.f32.gmra.mxu1 %v743_v40  ;;  %1894 = vmatprep.subr.mxu1 %v2183_v0  ;;  %v1045_v40 = vld [vmem:[#allocation9 + $0x110] sm:$0xff]  ;;  %v1044_v41 = vld [vmem:[#allocation9 + $0x108] sm:$0xff] }
 0x165   : > { %v688_v47 = vpop.f32.mrf.mxu0  ;;  %1895 = vmatpush3.msra.mxu1 %v1056_v42  ;;  %1810 = vmatprep.mubr.msk.f32.mxu1 %vm2184_vm0, %v2183_v0 }
 0x166   : > { %v744_v48 = vmax.f32 %v735_v45, 0.0  ;;  %v720_v49 = vadd.f32 %v688_v47, %v553_v44  ;;  %1896 = vmatprep.subr.mxu1 %v2183_v0  ;;  %v1043_v44 = vld [vmem:[#allocation9 + $0x100] sm:$0xff] }
 0x167   : > { %v1756_v51 = vpop.f32.mrf.mxu0  ;;  %v762_v52 = vld [vmem:[#allocation3] sm:$0xff]  ;;  %1897 = vmatpush3.msra.mxu1 %v1055_v46 }
 0x168   : > { %753 = vst [vmem:[#allocation3 + $0x11] sm:$0xfc] %v744_v48  ;;  %v736_v54 = vadd.f32 %v2560_v26, %v720_v49  ;;  %1864 = vmatmul.mubr.f32.vlgmr.msra.gmra.mxu0 %v762_v52  ;;  %1898 = vmatprep.subr.mxu1 %v2183_v0 }
 0x169   : > { %v693_v56 = vpop.f32.mrf.mxu0  ;;  %1866 = vmatprep.mubr.msk.f32.mxu0 %vm2184_vm0, %v2183_v0  ;;  %1899 = vmatpush3.msra.mxu1 %v1054_v50 }
 0x16a   : > { %v745_v57 = vmax.f32 %v736_v54, 0.0  ;;  %v721_v58 = vadd.f32 %v693_v56, %v558_v53  ;;  %1900 = vmatprep.subr.mxu1 %v2183_v0 }
 0x16b   : > { %v1759_v60 = vpop.f32.mrf.mxu0  ;;  %v763_v61 = vld [vmem:[#allocation3 + $0x8] sm:$0xff]  ;;  %1901 = vmatpush3.msra.mxu1 %v1053_v55 }
 0x16c   : > { %754 = vst [vmem:[#allocation3 + $0x19] sm:$0xff] %v745_v57  ;;  %v737_v63 = vadd.f32 %v2560_v26, %v721_v58  ;;  %1867 = vmatmul.mubr.f32.gmra.mxu0 %v763_v61  ;;  %1902 = vmatprep.subr.mxu1 %v2183_v0  ;;  %v1033_v45 = vld [vmem:[#allocation3 + $0x2] sm:$0xff]  ;;  %v1034_v46 = vld [vmem:[#allocation3 + $0xa] sm:$0xff] }
 0x16d   : > { %v698_v2 = vpop.f32.mrf.mxu0  ;;  %1869 = vmatprep.mubr.msk.f32.mxu0 %vm2184_vm0, %v2183_v0  ;;  %1903 = vmatpush3.msra.mxu1 %v1052_v59 }
 0x16e   : > { %v746_v3 = vmax.f32 %v737_v63, 0.0  ;;  %v722_v4 = vadd.f32 %v698_v2, %v563_v62  ;;  %1904 = vmatprep.subr.mxu1 %v2183_v0 }
 0x16f   : > { %v1762_v5 = vpop.f32.mrf.mxu0  ;;  %v789_v6 = vld [vmem:[#allocation3 + $0x11] sm:$0xff]  ;;  %1905 = vmatpush3.msra.mxu1 %v1051_v1 }
 0x170   : > { %v764_v7 = vld [vmem:[#allocation3 + $0x10] sm:$0xff]  ;;  %755 = vst [vmem:[#allocation3 + $0x21] sm:$0xf3] %v746_v3   ;;  %v738_v9 = vadd.f32 %v2560_v26, %v722_v4  ;;  %1811 = vmatmul.mubr.f32.gmra.mxu1 %v789_v6  ;;  %1906 = vmatprep.subr.mxu1 %v2183_v0 }
 0x171   : > { %1870 = vmatmul.mubr.f32.gmra.mxu0 %v764_v7  ;;  %v703_v11 = vpop.f32.mrf.mxu0  ;;  %1813 = vmatprep.mubr.msk.f32.mxu1 %vm2184_vm0, %v2183_v0 }
 0x172   : > { %1872 = vmatprep.mubr.msk.f32.mxu0 %vm2184_vm0, %v2183_v0  ;;  %v747_v14 = vmax.f32 %v738_v9, 0.0  ;;  %v723_v15 = vadd.f32 %v703_v11, %v568_v8  ;;  %1907 = vmatpush3.msra.mxu1 %v1050_v10 }
 0x173   : > { %v1765_v18 = vpop.f32.mrf.mxu0  ;;  %v765_v19 = vld [vmem:[#allocation3 + $0x18] sm:$0xff]  ;;  %1908 = vmatprep.subr.mxu1 %v2183_v0 }
 0x174   : > { %757 = vst [vmem:[#allocation3 + $0x29] sm:$0xff] %v747_v14  ;;  %v739_v13 = vadd.f32 %v2560_v26, %v723_v15  ;;  %1814 = vmatmul.mubr.f32.gmra.mxu1 %v745_v57  ;;  %v1035_v47 = vld [vmem:[#allocation3 + $0x12] sm:$0xff] }
 0x175   : > { %1873 = vmatmul.mubr.f32.gmra.mxu0 %v765_v19  ;;  %v708_v23 = vpop.f32.mrf.mxu0  ;;  %1816 = vmatprep.mubr.msk.f32.mxu1 %vm2184_vm0, %v2183_v0 }
 0x176   : > { %1875 = vmatprep.mubr.msk.f32.mxu0 %vm2184_vm0, %v2183_v0  ;;  %v748_v24 = vmax.f32 %v739_v13, 0.0  ;;  %v724_v25 = vadd.f32 %v708_v23, %v573_v12  ;;  %1909 = vmatpush3.msra.mxu1 %v1049_v22 }
 0x177   : > { %v1768_v27 = vpop.f32.mrf.mxu0  ;;  %v791_v28 = vld [vmem:[#allocation3 + $0x21] sm:$0xff]  ;;  %1910 = vmatprep.subr.mxu1 %v2183_v0 }
 0x178   : > { %v766_v16 = vld [vmem:[#allocation3 + $0x20] sm:$0xff]  ;;  %758 = vst [vmem:[#allocation3 + $0x31] sm:$0xcf] %v748_v24   ;;  %v740_v29 = vadd.f32 %v2560_v26, %v724_v25  ;;  %1817 = vmatmul.mubr.f32.gmra.mxu1 %v791_v28 }
 0x179   : > { %1876 = vmatmul.mubr.f32.gmra.mxu0 %v766_v16  ;;  %v713_v31 = vpop.f32.mrf.mxu0  ;;  %1819 = vmatprep.mubr.msk.f32.mxu1 %vm2184_vm0, %v2183_v0  ;;  %v1036_v48 = vld [vmem:[#allocation3 + $0x1a] sm:$0xff] }
 0x17a   : > { %1878 = vmatprep.mubr.msk.f32.mxu0 %vm2184_vm0, %v2183_v0  ;;  %v749_v32 = vmax.f32 %v740_v29, 0.0  ;;  %v725_v33 = vadd.f32 %v713_v31, %v578_v17  ;;  %1911 = vmatpush3.msra.mxu1 %v1048_v30  ;;  %v2663_v31 = vld [vmem:[%s2753_s4] ss:$0 sm:$0xff] }
 0x17b   : > { %v1771_v34 = vpop.f32.mrf.mxu0  ;;  %v767_v35 = vld [vmem:[#allocation3 + $0x28] sm:$0xff]  ;;  %1912 = vmatprep.subr.mxu1 %v2183_v0 }
 0x17c   : > { %760 = vst [vmem:[#allocation3 + $0x39] sm:$0xff] %v749_v32  ;;  %v741_v20 = vadd.f32 %v2560_v26, %v725_v33  ;;  %1820 = vmatmul.mubr.f32.gmra.mxu1 %v747_v14  ;;  %v1037_v49 = vld [vmem:[#allocation3 + $0x22] sm:$0xff] }
 0x17d   : > { %1879 = vmatmul.mubr.f32.gmra.mxu0 %v767_v35  ;;  %1822 = vmatprep.mubr.msk.f32.mxu1 %vm2184_vm0, %v2183_v0  ;;  %v1187_v33 = vld [vmem:[%s2360_s13] sm:$0xff] }
 0x17e   : > { %1881 = vmatprep.mubr.msk.f32.mxu0 %vm2184_vm0, %v2183_v0  ;;  %v750_v36 = vmax.f32 %v741_v20, 0.0  ;;  %1913 = vmatpush3.msra.mxu1 %v1047_v21 }
 0x17f   : > { %v793_v37 = vld [vmem:[#allocation3 + $0x31] sm:$0xff]  ;;  %1914 = vmatprep.subr.mxu1 %v2183_v0 }
 0x180   : > { %v768_v38 = vld [vmem:[#allocation3 + $0x30] sm:$0xff]  ;;  %761 = vst [vmem:[#allocation3 + $0x41] sm:$0x3f] %v750_v36  ;;  %1823 = vmatmul.mubr.f32.gmra.mxu1 %v793_v37 }
 0x181   : > { %1882 = vmatmul.mubr.f32.gmra.mxu0 %v768_v38  ;;  %1825 = vmatprep.mubr.msk.f32.mxu1 %vm2184_vm0, %v2183_v0  ;;  %v1038_v50 = vld [vmem:[#allocation3 + $0x2a] sm:$0xff] }
 0x182   : > { %1884 = vmatprep.mubr.msk.f32.mxu0 %vm2184_vm0, %v2183_v0  ;;  %1915 = vmatpush3.msra.mxu1 %v1046_v39  ;;  %v1188_v38 = vld [vmem:[%s2360_s13 + $0x8] sm:$0xff] }
 0x183   : > { %v769_v26 = vld [vmem:[#allocation3 + $0x38] sm:$0xff]  ;;  %1916 = vmatprep.subr.mxu1 %v2183_v0 }
 0x184   : > { %1826 = vmatmul.mubr.f32.gmra.mxu1 %v749_v32  ;;  %v1039_v51 = vld [vmem:[#allocation3 + $0x32] sm:$0xff] }
 0x185   : > { %1885 = vmatmul.mubr.f32.gmra.mxu0 %v769_v26  ;;  %1828 = vmatprep.mubr.msk.f32.mxu1 %vm2184_vm0, %v2183_v0 }
 0x186   : > { %1887 = vmatprep.mubr.msk.f32.mxu0 %vm2184_vm0, %v2183_v0  ;;  %1917 = vmatpush3.msra.mxu1 %v1045_v40 }
 0x187   : > { %v795_v42 = vld [vmem:[#allocation3 + $0x41] sm:$0x3f]  ;;  %1918 = vmatprep.subr.mxu1 %v2183_v0 }
 0x188   : > { %v770_v43 = vld [vmem:[#allocation3 + $0x40] sm:$0x3f]  ;;  %1829 = vmatmul.mubr.f32.gmra.mxu1 %v795_v42 }
 0x189   : > { %1888 = vmatmul.mubr.f32.gmra.mxu0 %v770_v43  ;;  %1919 = vmatpush3.msra.mxu1 %v1044_v41  ;;  %v1040_v52 = vld [vmem:[#allocation3 + $0x3a] sm:$0xff]  ;;  %v1041_v53 = vld [vmem:[#allocation3 + $0x42] sm:$0x3f] }
 0x18a   : > { %1922 = vmatprep.mubr.msk.f32.mxu1 %vm2184_vm0, %v2183_v0  ;;  %1920 = vmatprep.subr.mxu1 %v2183_v0 }
 0x18b   : > { %1921 = vmatpush3.msra.mxu1 %v1043_v44 }
 0x18c   : > { %1923 = vmatmul.mubr.f32.vlgmr.msra.gmra.mxu1 %v1033_v45  ;;  %v2022_v45 = vld [vmem:[#allocation2 + $0x13] sm:$0xff] }
 0x18d   : > { %1925 = vmatprep.mubr.msk.f32.mxu1 %vm2184_vm0, %v2183_v0 }
 0x190   : > { %1926 = vmatmul.mubr.f32.gmra.mxu1 %v1034_v46  ;;  %v1210_v46 = vrot.slane %v2022_v45, 6 }
 0x191   : > { %1928 = vmatprep.mubr.msk.f32.mxu1 %vm2184_vm0, %v2183_v0 }
 0x194   : > { %1929 = vmatmul.mubr.f32.gmra.mxu1 %v1035_v47 }
 0x195   : > { %1931 = vmatprep.mubr.msk.f32.mxu1 %vm2184_vm0, %v2183_v0 }
 0x198   : > { %1932 = vmatmul.mubr.f32.gmra.mxu1 %v1036_v48  ;;  %v2023_v48 = vld [vmem:[#allocation2 + $0x1b] sm:$0xff] }
 0x199   : > { %1934 = vmatprep.mubr.msk.f32.mxu1 %vm2184_vm0, %v2183_v0 }
 0x19c   : > { %1935 = vmatmul.mubr.f32.gmra.mxu1 %v1037_v49  ;;  %v1211_v49 = vrot.slane %v2023_v48, 6 }
 0x19d   : > { %1937 = vmatprep.mubr.msk.f32.mxu1 %vm2184_vm0, %v2183_v0 }
 0x1a0   : > { %1938 = vmatmul.mubr.f32.gmra.mxu1 %v1038_v50 }
 0x1a1   : > { %1940 = vmatprep.mubr.msk.f32.mxu1 %vm2184_vm0, %v2183_v0 }
 0x1a4   : > { %1941 = vmatmul.mubr.f32.gmra.mxu1 %v1039_v51 }
 0x1a5   : > { %1943 = vmatprep.mubr.msk.f32.mxu1 %vm2184_vm0, %v2183_v0 }
 0x1a8   : > { %1944 = vmatmul.mubr.f32.gmra.mxu1 %v1040_v52 }
 0x1a9   : > { %1946 = vmatprep.mubr.msk.f32.mxu1 %vm2184_vm0, %v2183_v0 }
 0x1ac   : > { %1947 = vmatmul.mubr.f32.gmra.mxu1 %v1041_v53 }
 0x220   : > { %v879_v54 = vpop.f32.mrf.mxu1 }
 0x222   : > { %v1806_v55 = vpop.f32.mrf.mxu1 }
 0x224   : > { %v884_v56 = vpop.f32.mrf.mxu1 }
 0x226   : > { %v1809_v57 = vpop.f32.mrf.mxu1 }
 0x228   : > { %v989_v58 = vpop.f32.mrf.mxu0 }
 0x229   : > { %v990_v29 = vadd.f32 %v989_v58, %v879_v54 }
 0x22a   : > { %v1865_v59 = vpop.f32.mrf.mxu0 }
 0x22c   : > { %v994_v60 = vpop.f32.mrf.mxu0 }
 0x22d   : > { %v995_v35 = vadd.f32 %v994_v60, %v884_v56  ;;  %v1212_v56 = vsel %vm1209_vm1, %v1210_v46, %v1211_v49 }
 0x22e   : > { %v1868_v61 = vpop.f32.mrf.mxu0 }
 0x230   : > { %v889_v62 = vpop.f32.mrf.mxu1 }
 0x231   : > { %v999_v63 = vpop.f32.mrf.mxu0 }
 0x232   : > { %v1812_v1 = vpop.f32.mrf.mxu1  ;;  %v1000_v26 = vadd.f32 %v999_v63, %v889_v62 }
 0x233   : > { %v1871_v2 = vpop.f32.mrf.mxu0  ;;  %v2024_v1 = vld [vmem:[#allocation2 + $0x25] sm:$0xff] }
 0x234   : > { %v894_v3 = vpop.f32.mrf.mxu1  ;;  %v1241_v2 = vrot.slane %v2024_v1, 4 }
 0x235   : > { %v1004_v4 = vpop.f32.mrf.mxu0 }
 0x236   : > { %v1815_v5 = vpop.f32.mrf.mxu1  ;;  %v1005_v50 = vadd.f32 %v1004_v4, %v894_v3  ;;  %v2025_v4 = vld [vmem:[#allocation2 + $0x2d] sm:$0xff] }
 0x237   : > { %v1874_v6 = vpop.f32.mrf.mxu0  ;;  %v1242_v5 = vrot.slane %v2025_v4, 4 }
 0x238   : > { %v899_v7 = vpop.f32.mrf.mxu1 }
 0x239   : > { %v1009_v0 = vpop.f32.mrf.mxu0 }
 0x23a   : > { %v1818_v8 = vpop.f32.mrf.mxu1  ;;  %v1010_v58 = vadd.f32 %v1009_v0, %v899_v7 }
 0x23b   : > { %v1877_v9 = vpop.f32.mrf.mxu0 }
 0x23c   : > { %v2644_v10 = vpop.f32.mrf.mxu1 }
 0x23d   : > { %v2646_v11 = vpop.f32.mrf.mxu0 }
 0x23e   : > { %v1821_v14 = vpop.f32.mrf.mxu1  ;;  %v1015_v6 = vadd.f32 %v2646_v11, %v2644_v10 }
 0x23f   : > { %v1880_v15 = vpop.f32.mrf.mxu0 }
 0x240   : > { %v2648_v18 = vpop.f32.mrf.mxu1 }
 0x241   : > { %v2650_v19 = vpop.f32.mrf.mxu0 }
 0x242   : > { %v1824_v12 = vpop.f32.mrf.mxu1 }
 0x243   : > { %v1883_v13 = vpop.f32.mrf.mxu0  ;;  %v1243_v12 = vsel %vm1240_vm2, %v1241_v2, %v1242_v5 }
 0x244   : > { %v2652_v22 = vpop.f32.mrf.mxu1 }
 0x245   : > { %v2654_v23 = vpop.f32.mrf.mxu0 }
 0x246   : > { %v1827_v24 = vpop.f32.mrf.mxu1 }
 0x247   : > { %v1886_v25 = vpop.f32.mrf.mxu0  ;;  %v1020_v24 = vadd.f32 %v2650_v19, %v2648_v18 }
 0x248   : > { %v2656_v27 = vpop.f32.mrf.mxu1 }
 0x249   : > { %v2658_v28 = vpop.f32.mrf.mxu0 }
 0x24a   : > { %v1830_v16 = vpop.f32.mrf.mxu1 }
 0x24b   : > { %v1889_v17 = vpop.f32.mrf.mxu0 }
 0x24c   : > { %v1125_v30 = vpop.f32.mrf.mxu1 }
 0x24d   : > { %v1169_v32 = vadd.f32 %v1125_v30, %v990_v29  ;;  %v2026_v30 = vld [vmem:[#allocation2 + $0x37] sm:$0xff] }
 0x24e   : > { %v1924_v34 = vpop.f32.mrf.mxu1 }
 0x24f   : > { %v1185_v20 = vadd.f32 %v2663_v31, %v1169_v32  ;;  %v1272_v32 = vrot.slane %v2026_v30, 2  ;;  %v2027_v34 = vld [vmem:[#allocation2 + $0x3f] sm:$0xff] }
 0x250   : > { %v1130_v21 = vpop.f32.mrf.mxu1 }
 0x251   : > { %v1189_v36 = vadd.f32 %v1187_v33, %v1185_v20  ;;  %v1170_v37 = vadd.f32 %v1130_v21, %v995_v35  ;;  %v1273_v35 = vrot.slane %v2027_v34, 2  ;;  %v1025_v20 = vadd.f32 %v2654_v23, %v2652_v22 }
 0x252   : > { %v1927_v39 = vpop.f32.mrf.mxu1 }
 0x253   : > { %v1191_v40 = vmax.f32 %v1189_v36, 0.0  ;;  %v1186_v41 = vadd.f32 %v2663_v31, %v1170_v37  ;;  %v1274_v39 = vsel %vm1271_vm3, %v1272_v32, %v1273_v35 }
 0x254   : > { %v1135_v42 = vpop.f32.mrf.mxu1 }
 0x255   : > { %1193 = vst [vmem:[%s2671_s12] sm:$0xff] %v1191_v40  ;;  %v1190_v43 = vadd.f32 %v1188_v38, %v1186_v41  ;;  %v1171_v44 = vadd.f32 %v1135_v42, %v1000_v26  ;;  %v1030_v40 = vadd.f32 %v2658_v28, %v2656_v27 }
 0x256   : > { %v1930_v47 = vpop.f32.mrf.mxu1 }
 0x257   : > { %v1192_v51 = vmax.f32 %v1190_v43, 0.0  ;;  %v1202_v52 = vadd.f32 %v2663_v31, %v1171_v44 }
 0x258   : > { %v1140_v53 = vpop.f32.mrf.mxu1 }
 0x259   : > { %1194 = vst [vmem:[%s2671_s12 + $0x8] sm:$0xff] %v1192_v51  ;;  %v1216_v54 = vadd.f32 %v1210_v46, %v1202_v52  ;;  %v1172_v55 = vadd.f32 %v1140_v53, %v1005_v50 }
 0x25a   : > { %v1933_v57 = vpop.f32.mrf.mxu1 }
 0x25b   : > { %v1219_v59 = vmax.f32 %v1216_v54, 0.0  ;;  %v1203_v60 = vadd.f32 %v2663_v31, %v1172_v55 }
 0x25c   : > { %v1145_v61 = vpop.f32.mrf.mxu1 }
 0x25d   : > { %1420 = vst [vmem:[%s2671_s12 + $0xe] sm:$0xfc] %v1219_v59  ;;  %v1217_v62 = vadd.f32 %v1212_v56, %v1203_v60  ;;  %v1173_v63 = vadd.f32 %v1145_v61, %v1010_v58 }
 0x25e   : > { %v1936_v3 = vpop.f32.mrf.mxu1 }
 0x25f   : > { %v1220_v8 = vmax.f32 %v1217_v62, 0.0  ;;  %v1204_v7 = vadd.f32 %v2663_v31, %v1173_v63 }
 0x260   : > { %v1150_v0 = vpop.f32.mrf.mxu1 }
 0x261   : > { %1421 = vst [vmem:[%s2671_s12 + $0x16] sm:$0xff] %v1220_v8  ;;  %v1218_v9 = vadd.f32 %v1211_v49, %v1204_v7  ;;  %v1247_v14 = vadd.f32 %v1241_v2, %v1204_v7  ;;  %v1174_v15 = vadd.f32 %v1150_v0, %v1015_v6 }
 0x262   : > { %v1939_v13 = vpop.f32.mrf.mxu1 }
 0x263   : > { %v1221_v25 = vmax.f32 %v1218_v9, 0.0  ;;  %v1250_v16 = vmax.f32 %v1247_v14, 0.0  ;;  %v1234_v10 = vadd.f32 %v2663_v31, %v1174_v15 }
 0x264   : > { %v1155_v11 = vpop.f32.mrf.mxu1 }
 0x265   : > { %1422 = vst [vmem:[%s2671_s12 + $0x1e] sm:$0x3] %v1221_v25  ;;  %1426 = vst [vmem:[%s2671_s12 + $0x1c] sm:$0xf0] %v1250_v16  ;;  %v1248_v17 = vadd.f32 %v1243_v12, %v1234_v10  ;;  %v1175_v29 = vadd.f32 %v1155_v11, %v1020_v24 }
 0x266   : > { %v1942_v33 = vpop.f32.mrf.mxu1 }
 0x267   : > { %v1251_v18 = vmax.f32 %v1248_v17, 0.0  ;;  %v1235_v19 = vadd.f32 %v2663_v31, %v1175_v29 }
 0x268   : > { %v1160_v21 = vpop.f32.mrf.mxu1 }
 0x269   : > { %1427 = vst [vmem:[%s2671_s12 + $0x24] sm:$0xff] %v1251_v18  ;;  %v1249_v36 = vadd.f32 %v1242_v5, %v1235_v19  ;;  %v1278_v37 = vadd.f32 %v1272_v32, %v1235_v19  ;;  %v1176_v38 = vadd.f32 %v1160_v21, %v1025_v20 }
 0x26a   : > { %v1945_v26 = vpop.f32.mrf.mxu1 }
 0x26b   : > { %v1252_v22 = vmax.f32 %v1249_v36, 0.0  ;;  %v1281_v23 = vmax.f32 %v1278_v37, 0.0  ;;  %v1265_v41 = vadd.f32 %v2663_v31, %v1176_v38 }
 0x26c   : > { %v1165_v42 = vpop.f32.mrf.mxu1 }
 0x26d   : > { %1428 = vst [vmem:[%s2671_s12 + $0x2c] sm:$0xf] %v1252_v22  ;;  %1432 = vst [vmem:[%s2671_s12 + $0x2a] sm:$0xc0] %v1281_v23  ;;  %v1279_v43 = vadd.f32 %v1274_v39, %v1265_v41  ;;  %v1177_v44 = vadd.f32 %v1165_v42, %v1030_v40 }
 0x26e   : > { %v1948_v45 = vpop.f32.mrf.mxu1 }
 0x26f   : > { %v1282_v46 = vmax.f32 %v1279_v43, 0.0  ;;  %v1266_v47 = vadd.f32 %v2663_v31, %v1177_v44 }
 0x271   : > { %1433 = vst [vmem:[%s2671_s12 + $0x32] sm:$0xff] %v1282_v46  ;;  %v1280_v27 = vadd.f32 %v1273_v35, %v1266_v47 }
 0x273   : > { %v1283_v28 = vmax.f32 %v1280_v27, 0.0 }
 0x275   : > { %1434 = vst [vmem:[%s2671_s12 + $0x3a] sm:$0x3f] %v1283_v28 }
 0x276   : > { %2121 = shalt.err (!%p2118_p3)
}
 0x277   : > { %s2122_s13 = scalar_lea.hbm %s2703_s11, 1024  ;;  %s2126_s9 = scalar_lea.hbm %s2754_s5, 2048 }
 0x278   : > { %p2123_p11 = scmp.ne.s32.totalorder %s2703_s11, %s2122_s13  ;;  %p2127_p4 = scmp.lt.s32.totalorder %s2703_s11, %s2754_s5 }
 0x279   : > { %p2128_p6 = scmp.lt.s32.totalorder %s2126_s9, %s2122_s13 }
 0x27a   : > { %p2124_p9 = pnand %p2123_p11, %p2771_p2 }
 0x27b   : > { %p2129_p8 = por %p2128_p6, %p2127_p4 }
 0x27c   : > { %p2125_p1 = pneg %p2124_p9 }
 0x27e   : > { %p2130_p5 = pnand %p2129_p8, %p2125_p1 }
 0x280   : > { %2133 = shalt.err (!%p2130_p5)
}
 0x281   : > { %s2186_s14 = smov 128   ;;  %s2187_s7 = smov 8  }
 0x282   : > { %1959 = dma.vmem_to_hbm [thread:$0]  (%p2771_p2), %s2705_s6, 1024, %s2703_s11, %s1289_s17, %s2186_s14, %s2186_s14, %s2187_s7  }
 0x283 PF: > { %s1318_s28 = sand.u32 1, %s2164_s18   ;;  %p2772_p7 = scmp.ne.s32.totalorder %s2761_s25, 0 }
 0x284   : > { %p2773_p12 = scmp.ge.s32.totalorder %s2176_s21, 2  ;;  %s1319_s16 = scalar_lea.sflag [#allocation6], %s1318_s28 }
 0x286   : > { %p1973_p13 = pnand %p2773_p12, %p2772_p7 }
 0x288   : > { %p1974_p0 = pneg %p1973_p13 }
 0x28a   : > { %2159 = dma.done.wait (%p1974_p0), %s1319_s16, 1024  }
 0x28b   : > { %2161 = vsyncadd (%p1974_p0), %s1319_s16, 4294966272  ;;  %p19_p10 = scmp.ge.s32.totalorder %s2296_s15, 4   ;;  %s2774_s18 = smov %s2168_s19 }
 0x28c   : > { %s2775_s19 = smov %s2172_s20  ;;  %s2776_s20 = smov %s2312_s27 }
 0x28d   : > { %s2777_s21 = smov %s2296_s15  ;;  %21 = sbr.rel (!%p19_p10) target bundleno = 6 (0x6), region = 103 }
 0x292   :  { %1324 = vsyncpa [#allocation5], 1 }
 0x293   :  { %1326 = vsyncpa [#allocation5 + $0x1], 1 }
 0x294   :  { %1327 = vsyncpa [#allocation8], 1 }
 0x295   :  { %1328 = vsyncpa [#allocation6], 1 }
 0x296   :  { %1330 = vsyncpa [#allocation6 + $0x1], 1 }

</bundles_post_ra>
